<compile_context>
chip_gen: v7x
topology: tpu7x:2x2x1
jax: 0.10.0
libtpu: 0.0.40
codegen_flags: <defaults>
</compile_context>

<pallas_src>
import functools
import numpy as np
import jax
import jax.numpy as jnp
from jax.experimental import pallas as pl
from jax.experimental.pallas import tpu as pltpu


# ----------------------------- configuration -----------------------------
class Config:
    n_enc_vocab = 32
    n_enc_seq = 8
    d_hidn = 32
    n_head = 2
    d_head = 16
    d_ff = 64
    n_layer = 2
    i_pad = 0
    dropout = 0.1            # eval mode -> identity
    layer_norm_epsilon = 1e-6


# ------------------------- sinusoid position table ------------------------
def get_sinusoid_encoding_table(n_seq, d_hidn):
    def cal_angle(position, i_hidn):
        return position / np.power(10000, 2 * (i_hidn // 2) / d_hidn)

    table = np.array(
        [[cal_angle(pos, i) for i in range(d_hidn)] for pos in range(n_seq)],
        dtype=np.float64,
    )
    table[:, 0::2] = np.sin(table[:, 0::2])
    table[:, 1::2] = np.cos(table[:, 1::2])
    return jnp.asarray(table, dtype=jnp.float32)


# ------------------------------ Pallas kernel ------------------------------
def _layer_norm(x, gamma, beta, eps):
    mean = jnp.mean(x, axis=-1, keepdims=True)
    var = jnp.mean(jnp.square(x - mean), axis=-1, keepdims=True)
    return (x - mean) * jax.lax.rsqrt(var + eps) * gamma + beta


def encoder_stack_kernel(
    x_ref, pad_ref, lnv_ref,
    wqkv_ref, bqkv_ref, wo_ref, w1_ref, b1_ref, w2_ref, vecs_ref,
    out_ref, attn_ref,
    *, n_layer, n_head, d_head, batch, seq, eps,
):
    HD = n_head * d_head

    x = x_ref[...]                                      # [B*S, D]
    # post-embedding LayerNorm (dropout == identity in eval mode)
    h = _layer_norm(x, lnv_ref[0:1, :], lnv_ref[1:2, :], eps)

    # compact key-pad mask [B, S], broadcast ONCE to [B, S_q, S_k]
    key_pad = pad_ref[...]
    mask_b = jnp.broadcast_to(key_pad[:, None, :] > 0.5, (batch, seq, seq))

    for l in range(n_layer):                            # static unroll (n_layer small)
        # ---------------- multi-head self-attention ----------------
        # single packed Q/K/V projection over the whole batch
        qkv = jnp.dot(h, wqkv_ref[l], preferred_element_type=jnp.float32) + bqkv_ref[l]
        qkv3 = qkv.reshape(batch, seq, 3 * HD)          # cheap sublane-split reshape

        ctx_parts = []
        for hd in range(n_head):
            lo = hd * d_head
            qh = qkv3[:, :, lo:lo + d_head]                       # [B,S,dh] (1/sqrt(dh) folded into W_Q)
            kh = qkv3[:, :, HD + lo:HD + lo + d_head]
            vh = qkv3[:, :, 2 * HD + lo:2 * HD + lo + d_head]

            scores = jnp.einsum('bqd,bkd->bqk', qh, kh,
                                preferred_element_type=jnp.float32)   # [B,S,S]
            scores = jnp.where(mask_b, -1e9, scores)
            m = jnp.max(scores, axis=-1, keepdims=True)
            e = jnp.exp(scores - m)
            probs = e * pl.reciprocal(jnp.sum(e, axis=-1, keepdims=True), approx=False)
            attn_ref[l, hd] = probs                                   # [B,S,S] store
            ctx_parts.append(jnp.einsum('bqk,bkd->bqd', probs, vh,
                                        preferred_element_type=jnp.float32))

        context = jnp.concatenate(ctx_parts, axis=-1).reshape(batch * seq, HD)
        att_out = jnp.dot(context, wo_ref[l],
                          preferred_element_type=jnp.float32) + vecs_ref[l, 0:1, :]
        h1 = _layer_norm(h + att_out, vecs_ref[l, 1:2, :], vecs_ref[l, 2:3, :], eps)

        # ---------------- position-wise FFN (Conv1d k=1 == dense) ----------------
        ff = jnp.dot(h1, w1_ref[l], preferred_element_type=jnp.float32) + b1_ref[l]
        # TODO(synk): tanh-approx GELU (PyTorch F.gelu default is exact erf)
        ff = jax.nn.gelu(ff, approximate=True)
        ff = jnp.dot(ff, w2_ref[l], preferred_element_type=jnp.float32) + vecs_ref[l, 3:4, :]
        h = _layer_norm(h1 + ff, vecs_ref[l, 4:5, :], vecs_ref[l, 5:6, :], eps)

    out_ref[...] = h


# ------------------------------ parameter init -----------------------------
def init_params(cfg, key):
    D, H, Dh, Dff, L = cfg.d_hidn, cfg.n_head, cfg.d_head, cfg.d_ff, cfg.n_layer
    HD = H * Dh
    keys = jax.random.split(key, 1 + L)
    emb = jax.random.normal(keys[0], (cfg.n_enc_vocab, D), jnp.float32) * 0.02
    pos_emb = get_sinusoid_encoding_table(cfg.n_enc_seq + 1, D)

    scale = 1.0 / (Dh ** 0.5)
    wqkv_l, bqkv_l, wo_l, w1_l, b1_l, w2_l, vecs_l = [], [], [], [], [], [], []
    for li in range(L):
        ks = jax.random.split(keys[1 + li], 6)
        s = 0.02
        wq = jax.random.normal(ks[0], (D, HD), jnp.float32) * s
        wk = jax.random.normal(ks[1], (D, HD), jnp.float32) * s
        wv = jax.random.normal(ks[2], (D, HD), jnp.float32) * s
        bq = jnp.zeros((HD,), jnp.float32)
        bk = jnp.zeros((HD,), jnp.float32)
        bv = jnp.zeros((HD,), jnp.float32)
        # fold the 1/sqrt(d_head) attention scale into the Q projection
        wqkv_l.append(jnp.concatenate([wq * scale, wk, wv], axis=1))      # [D, 3HD]
        bqkv_l.append(jnp.concatenate([bq * scale, bk, bv])[None, :])     # [1, 3HD]
        wo_l.append(jax.random.normal(ks[3], (HD, D), jnp.float32) * s)
        w1_l.append(jax.random.normal(ks[4], (D, Dff), jnp.float32) * s)
        b1_l.append(jnp.zeros((1, Dff), jnp.float32))
        w2_l.append(jax.random.normal(ks[5], (Dff, D), jnp.float32) * s)
        # pack all per-layer [D]-vectors: b_O, ln1_g, ln1_b, b2, ln2_g, ln2_b
        vecs_l.append(jnp.stack([
            jnp.zeros((D,), jnp.float32),   # b_O
            jnp.ones((D,), jnp.float32),    # ln1 gamma
            jnp.zeros((D,), jnp.float32),   # ln1 beta
            jnp.zeros((D,), jnp.float32),   # b2
            jnp.ones((D,), jnp.float32),    # ln2 gamma
            jnp.zeros((D,), jnp.float32),   # ln2 beta
        ], axis=0))

    packed = dict(
        lnv=jnp.stack([jnp.ones((D,), jnp.float32),
                       jnp.zeros((D,), jnp.float32)], axis=0),   # post-emb LN gamma/beta
        wqkv=jnp.stack(wqkv_l), bqkv=jnp.stack(bqkv_l),
        wo=jnp.stack(wo_l),
        w1=jnp.stack(w1_l), b1=jnp.stack(b1_l), w2=jnp.stack(w2_l),
        vecs=jnp.stack(vecs_l),
    )
    return dict(emb=emb, pos_emb=pos_emb, packed=packed)


# ------------------------------ full Encoder -------------------------------
def encoder_forward(inputs, params, cfg, scale_emb=False):
    B, S = inputs.shape
    D, H, L = cfg.d_hidn, cfg.n_head, cfg.n_layer

    # --- Embeding (gathers stay in plain JAX) ---
    positions = jnp.broadcast_to(jnp.arange(S, dtype=jnp.int32)[None, :] + 1, (B, S))
    pad_tok = inputs == cfg.i_pad                                 # [B, S]
    positions = jnp.where(pad_tok, 0, positions)
    x = jnp.take(params["emb"], inputs, axis=0) \
        + jnp.take(params["pos_emb"], positions, axis=0)          # [B, S, D]
    if scale_emb:
        x = x * (cfg.d_hidn ** 0.5)
    # dropout: eval mode -> identity

    x2 = x.reshape(B * S, D).astype(jnp.float32)
    key_pad = pad_tok.astype(jnp.float32)                         # compact [B, S] mask

    p = params["packed"]
    kernel = functools.partial(
        encoder_stack_kernel, n_layer=L, n_head=H, d_head=cfg.d_head,
        batch=B, seq=S, eps=cfg.layer_norm_epsilon)

    out2, attn = pl.pallas_call(
        kernel,
        out_shape=(
            jax.ShapeDtypeStruct((B * S, D), jnp.float32),
            jax.ShapeDtypeStruct((L, H, B, S, S), jnp.float32),
        ),
        compiler_params=pltpu.CompilerParams(vmem_limit_bytes=32 * 1024 * 1024),
    )(x2, key_pad, p["lnv"], p["wqkv"], p["bqkv"], p["wo"],
      p["w1"], p["b1"], p["w2"], p["vecs"])

    outputs = out2.reshape(B, S, D)
    # attn is [L, H, B, S, S]; PyTorch layer output is [B, H, S, S] per layer
    attn_probs = [jnp.transpose(attn[l], (1, 0, 2, 3)) for l in range(L)]
    return outputs, attn_probs


# ---------------------------------- main -----------------------------------
if __name__ == "__main__":
    cfg = Config()
    key = jax.random.PRNGKey(0)
    pkey, ikey = jax.random.split(key)
    params = init_params(cfg, pkey)

    B, S = 2, cfg.n_enc_seq
    inputs = jax.random.randint(ikey, (B, S), 1, cfg.n_enc_vocab, dtype=jnp.int32)
    # add some padding tokens (i_pad = 0)
    inputs = inputs.at[0, -2:].set(cfg.i_pad)
    inputs = inputs.at[1, -3:].set(cfg.i_pad)

    outputs, attn_probs = encoder_forward(inputs, params, cfg, scale_emb=False)
    outputs = jax.block_until_ready(outputs)
    attn_probs = [jax.block_until_ready(a) for a in attn_probs]

    assert outputs.shape == (B, S, cfg.d_hidn)
    assert len(attn_probs) == cfg.n_layer
    assert all(a.shape == (B, cfg.n_head, S, S) for a in attn_probs)
    assert bool(jnp.all(jnp.isfinite(outputs)))
    print("KERNEL_OK")
</pallas_src>

<mosaic_0001>
module attributes {stable_mosaic.version = 11 : i64} {
  func.func @encoder_stack_kernel(%arg0: memref<16x32xf32, #tpu.memory_space<vmem>>, %arg1: memref<2x8xf32, #tpu.memory_space<vmem>>, %arg2: memref<2x32xf32, #tpu.memory_space<vmem>>, %arg3: memref<2x32x96xf32, #tpu.memory_space<vmem>>, %arg4: memref<2x1x96xf32, #tpu.memory_space<vmem>>, %arg5: memref<2x32x32xf32, #tpu.memory_space<vmem>>, %arg6: memref<2x32x64xf32, #tpu.memory_space<vmem>>, %arg7: memref<2x1x64xf32, #tpu.memory_space<vmem>>, %arg8: memref<2x64x32xf32, #tpu.memory_space<vmem>>, %arg9: memref<2x6x32xf32, #tpu.memory_space<vmem>>, %arg10: memref<16x32xf32, #tpu.memory_space<vmem>>, %arg11: memref<2x2x2x8x8xf32, #tpu.memory_space<vmem>>) attributes {dimension_semantics = [], scalar_prefetch = 0 : i64, scratch_operands = 0 : i64, tpu.core_type = #tpu.core_type<tc>} {
    %c0 = arith.constant 0 : index
    %c0_0 = arith.constant 0 : index
    %0 = vector.load %arg0[%c0, %c0_0] : memref<16x32xf32, #tpu.memory_space<vmem>>, vector<16x32xf32>
    %c0_1 = arith.constant 0 : index
    %c0_2 = arith.constant 0 : index
    %1 = vector.load %arg2[%c0_1, %c0_2] : memref<2x32xf32, #tpu.memory_space<vmem>>, vector<1x32xf32>
    %c1 = arith.constant 1 : index
    %c0_3 = arith.constant 0 : index
    %2 = vector.load %arg2[%c1, %c0_3] : memref<2x32xf32, #tpu.memory_space<vmem>>, vector<1x32xf32>
    %cst = arith.constant dense<0.000000e+00> : vector<16xf32>
    %3 = vector.multi_reduction <add>, %0, %cst [1] : vector<16x32xf32> to vector<16xf32>
    %4 = vector.shape_cast %3 : vector<16xf32> to vector<16x1xf32>
    %cst_4 = arith.constant 3.200000e+01 : f32
    %5 = vector.broadcast %cst_4 : f32 to vector<16x1xf32>
    %6 = arith.divf %4, %5 : vector<16x1xf32>
    %7 = vector.broadcast %6 : vector<16x1xf32> to vector<16x32xf32>
    %8 = arith.subf %0, %7 : vector<16x32xf32>
    %9 = arith.mulf %8, %8 : vector<16x32xf32>
    %cst_5 = arith.constant dense<0.000000e+00> : vector<16xf32>
    %10 = vector.multi_reduction <add>, %9, %cst_5 [1] : vector<16x32xf32> to vector<16xf32>
    %11 = vector.shape_cast %10 : vector<16xf32> to vector<16x1xf32>
    %cst_6 = arith.constant 3.200000e+01 : f32
    %12 = vector.broadcast %cst_6 : f32 to vector<16x1xf32>
    %13 = arith.divf %11, %12 : vector<16x1xf32>
    %14 = vector.broadcast %6 : vector<16x1xf32> to vector<16x32xf32>
    %15 = arith.subf %0, %14 : vector<16x32xf32>
    %cst_7 = arith.constant 9.99999997E-7 : f32
    %16 = vector.broadcast %cst_7 : f32 to vector<16x1xf32>
    %17 = arith.addf %13, %16 : vector<16x1xf32>
    %18 = math.rsqrt %17 : vector<16x1xf32>
    %19 = vector.broadcast %18 : vector<16x1xf32> to vector<16x32xf32>
    %20 = arith.mulf %15, %19 : vector<16x32xf32>
    %21 = vector.broadcast %1 : vector<1x32xf32> to vector<16x32xf32>
    %22 = arith.mulf %20, %21 : vector<16x32xf32>
    %23 = vector.broadcast %2 : vector<1x32xf32> to vector<16x32xf32>
    %24 = arith.addf %22, %23 : vector<16x32xf32>
    %c0_8 = arith.constant 0 : index
    %c0_9 = arith.constant 0 : index
    %25 = vector.load %arg1[%c0_8, %c0_9] : memref<2x8xf32, #tpu.memory_space<vmem>>, vector<2x8xf32>
    %26 = vector.shape_cast %25 : vector<2x8xf32> to vector<2x1x8xf32>
    %cst_10 = arith.constant 5.000000e-01 : f32
    %27 = vector.broadcast %cst_10 : f32 to vector<2x1x8xf32>
    %28 = arith.cmpf ogt, %26, %27 : vector<2x1x8xf32>
    %29 = vector.shape_cast %28 : vector<2x1x8xi1> to vector<2x1x8xi1>
    %30 = vector.broadcast %29 : vector<2x1x8xi1> to vector<2x8x8xi1>
    %c0_11 = arith.constant 0 : index
    %c0_12 = arith.constant 0 : index
    %c0_13 = arith.constant 0 : index
    %31 = vector.load %arg3[%c0_11, %c0_12, %c0_13] : memref<2x32x96xf32, #tpu.memory_space<vmem>>, vector<1x32x96xf32>
    %32 = vector.shape_cast %31 : vector<1x32x96xf32> to vector<32x96xf32>
    %cst_14 = arith.constant dense<0.000000e+00> : vector<16x96xf32>
    %33 = tpu.matmul %24, %32, %cst_14 {dimension_numbers = #tpu.dot_dimension_numbers<[1], [0], [0], [1], [0, 0, 1, 1], [], []>} : vector<16x32xf32>, vector<32x96xf32>, vector<16x96xf32> -> vector<16x96xf32>
    %c0_15 = arith.constant 0 : index
    %c0_16 = arith.constant 0 : index
    %c0_17 = arith.constant 0 : index
    %34 = vector.load %arg4[%c0_15, %c0_16, %c0_17] : memref<2x1x96xf32, #tpu.memory_space<vmem>>, vector<1x1x96xf32>
    %35 = vector.shape_cast %34 : vector<1x1x96xf32> to vector<1x96xf32>
    %36 = vector.broadcast %35 : vector<1x96xf32> to vector<16x96xf32>
    %37 = arith.addf %33, %36 : vector<16x96xf32>
    %38 = vector.shape_cast %37 : vector<16x96xf32> to vector<2x8x96xf32>
    %39 = vector.extract_strided_slice %38 {offsets = [0, 0, 0], sizes = [2, 8, 16], strides = [1, 1, 1]} : vector<2x8x96xf32> to vector<2x8x16xf32>
    %40 = vector.extract_strided_slice %38 {offsets = [0, 0, 32], sizes = [2, 8, 16], strides = [1, 1, 1]} : vector<2x8x96xf32> to vector<2x8x16xf32>
    %41 = vector.extract_strided_slice %38 {offsets = [0, 0, 64], sizes = [2, 8, 16], strides = [1, 1, 1]} : vector<2x8x96xf32> to vector<2x8x16xf32>
    "tpu.trace_start"() <{level = 10 : i32, message = "bqd,bkd->bqk"}> : () -> ()
    %cst_18 = arith.constant dense<0.000000e+00> : vector<2x8x8xf32>
    %42 = tpu.matmul %39, %40, %cst_18 {dimension_numbers = #tpu.dot_dimension_numbers<[2], [2], [1], [1], [0, 0, 0, 1, 1, 1], [0], [0]>} : vector<2x8x16xf32>, vector<2x8x16xf32>, vector<2x8x8xf32> -> vector<2x8x8xf32>
    %cst_19 = arith.constant -1.000000e+09 : f32
    "tpu.trace_stop"() : () -> ()
    %43 = vector.broadcast %cst_19 : f32 to vector<2x8x8xf32>
    %44 = arith.select %30, %43, %42 : vector<2x8x8xi1>, vector<2x8x8xf32>
    %cst_20 = arith.constant dense<0xFF800000> : vector<2x8xf32>
    %45 = vector.multi_reduction <maximumf>, %44, %cst_20 [2] : vector<2x8x8xf32> to vector<2x8xf32>
    %46 = vector.shape_cast %45 : vector<2x8xf32> to vector<2x8x1xf32>
    %47 = vector.broadcast %46 : vector<2x8x1xf32> to vector<2x8x8xf32>
    %48 = arith.subf %44, %47 : vector<2x8x8xf32>
    %49 = math.exp %48 : vector<2x8x8xf32>
    %cst_21 = arith.constant dense<0.000000e+00> : vector<2x8xf32>
    %50 = vector.multi_reduction <add>, %49, %cst_21 [2] : vector<2x8x8xf32> to vector<2x8xf32>
    %51 = vector.shape_cast %50 : vector<2x8xf32> to vector<2x8x1xf32>
    %52 = tpu.reciprocal %51 : vector<2x8x1xf32> -> vector<2x8x1xf32>
    %53 = vector.broadcast %52 : vector<2x8x1xf32> to vector<2x8x8xf32>
    %54 = arith.mulf %49, %53 : vector<2x8x8xf32>
    %c0_22 = arith.constant 0 : index
    %c0_23 = arith.constant 0 : index
    %c0_24 = arith.constant 0 : index
    %c0_25 = arith.constant 0 : index
    %c0_26 = arith.constant 0 : index
    %55 = vector.load %arg11[%c0_22, %c0_23, %c0_24, %c0_25, %c0_26] : memref<2x2x2x8x8xf32, #tpu.memory_space<vmem>>, vector<1x1x2x8x8xf32>
    %56 = vector.shape_cast %55 : vector<1x1x2x8x8xf32> to vector<2x8x8xf32>
    %57 = vector.shape_cast %54 : vector<2x8x8xf32> to vector<1x1x2x8x8xf32>
    tpu.vector_store %arg11[%c0_22, %c0_23, %c0_24, %c0_25, %c0_26], %57 {strides = array<i32>} : memref<2x2x2x8x8xf32, #tpu.memory_space<vmem>>, vector<1x1x2x8x8xf32>,
    "tpu.trace_start"() <{level = 10 : i32, message = "bqk,bkd->bqd"}> : () -> ()
    %cst_27 = arith.constant dense<0.000000e+00> : vector<2x8x16xf32>
    %58 = tpu.matmul %54, %41, %cst_27 {dimension_numbers = #tpu.dot_dimension_numbers<[2], [1], [1], [2], [0, 0, 0, 1, 1, 2], [0], [0]>} : vector<2x8x8xf32>, vector<2x8x16xf32>, vector<2x8x16xf32> -> vector<2x8x16xf32>
    "tpu.trace_stop"() : () -> ()
    %59 = vector.extract_strided_slice %38 {offsets = [0, 0, 16], sizes = [2, 8, 16], strides = [1, 1, 1]} : vector<2x8x96xf32> to vector<2x8x16xf32>
    %60 = vector.extract_strided_slice %38 {offsets = [0, 0, 48], sizes = [2, 8, 16], strides = [1, 1, 1]} : vector<2x8x96xf32> to vector<2x8x16xf32>
    %61 = vector.extract_strided_slice %38 {offsets = [0, 0, 80], sizes = [2, 8, 16], strides = [1, 1, 1]} : vector<2x8x96xf32> to vector<2x8x16xf32>
    "tpu.trace_start"() <{level = 10 : i32, message = "bqd,bkd->bqk"}> : () -> ()
    %cst_28 = arith.constant dense<0.000000e+00> : vector<2x8x8xf32>
    %62 = tpu.matmul %59, %60, %cst_28 {dimension_numbers = #tpu.dot_dimension_numbers<[2], [2], [1], [1], [0, 0, 0, 1, 1, 1], [0], [0]>} : vector<2x8x16xf32>, vector<2x8x16xf32>, vector<2x8x8xf32> -> vector<2x8x8xf32>
    %cst_29 = arith.constant -1.000000e+09 : f32
    "tpu.trace_stop"() : () -> ()
    %63 = vector.broadcast %cst_29 : f32 to vector<2x8x8xf32>
    %64 = arith.select %30, %63, %62 : vector<2x8x8xi1>, vector<2x8x8xf32>
    %cst_30 = arith.constant dense<0xFF800000> : vector<2x8xf32>
    %65 = vector.multi_reduction <maximumf>, %64, %cst_30 [2] : vector<2x8x8xf32> to vector<2x8xf32>
    %66 = vector.shape_cast %65 : vector<2x8xf32> to vector<2x8x1xf32>
    %67 = vector.broadcast %66 : vector<2x8x1xf32> to vector<2x8x8xf32>
    %68 = arith.subf %64, %67 : vector<2x8x8xf32>
    %69 = math.exp %68 : vector<2x8x8xf32>
    %cst_31 = arith.constant dense<0.000000e+00> : vector<2x8xf32>
    %70 = vector.multi_reduction <add>, %69, %cst_31 [2] : vector<2x8x8xf32> to vector<2x8xf32>
    %71 = vector.shape_cast %70 : vector<2x8xf32> to vector<2x8x1xf32>
    %72 = tpu.reciprocal %71 : vector<2x8x1xf32> -> vector<2x8x1xf32>
    %73 = vector.broadcast %72 : vector<2x8x1xf32> to vector<2x8x8xf32>
    %74 = arith.mulf %69, %73 : vector<2x8x8xf32>
    %c0_32 = arith.constant 0 : index
    %c1_33 = arith.constant 1 : index
    %c0_34 = arith.constant 0 : index
    %c0_35 = arith.constant 0 : index
    %c0_36 = arith.constant 0 : index
    %75 = vector.load %arg11[%c0_32, %c1_33, %c0_34, %c0_35, %c0_36] : memref<2x2x2x8x8xf32, #tpu.memory_space<vmem>>, vector<1x1x2x8x8xf32>
    %76 = vector.shape_cast %75 : vector<1x1x2x8x8xf32> to vector<2x8x8xf32>
    %77 = vector.shape_cast %74 : vector<2x8x8xf32> to vector<1x1x2x8x8xf32>
    tpu.vector_store %arg11[%c0_32, %c1_33, %c0_34, %c0_35, %c0_36], %77 {strides = array<i32>} : memref<2x2x2x8x8xf32, #tpu.memory_space<vmem>>, vector<1x1x2x8x8xf32>,
    "tpu.trace_start"() <{level = 10 : i32, message = "bqk,bkd->bqd"}> : () -> ()
    %cst_37 = arith.constant dense<0.000000e+00> : vector<2x8x16xf32>
    %78 = tpu.matmul %74, %61, %cst_37 {dimension_numbers = #tpu.dot_dimension_numbers<[2], [1], [1], [2], [0, 0, 0, 1, 1, 2], [0], [0]>} : vector<2x8x8xf32>, vector<2x8x16xf32>, vector<2x8x16xf32> -> vector<2x8x16xf32>
    "tpu.trace_stop"() : () -> ()
    %79 = tpu.concatenate %58, %78 in 2 : vector<2x8x16xf32>, vector<2x8x16xf32> -> vector<2x8x32xf32>
    %80 = vector.shape_cast %79 : vector<2x8x32xf32> to vector<16x32xf32>
    %c0_38 = arith.constant 0 : index
    %c0_39 = arith.constant 0 : index
    %c0_40 = arith.constant 0 : index
    %81 = vector.load %arg5[%c0_38, %c0_39, %c0_40] : memref<2x32x32xf32, #tpu.memory_space<vmem>>, vector<1x32x32xf32>
    %82 = vector.shape_cast %81 : vector<1x32x32xf32> to vector<32x32xf32>
    %cst_41 = arith.constant dense<0.000000e+00> : vector<16x32xf32>
    %83 = tpu.matmul %80, %82, %cst_41 {dimension_numbers = #tpu.dot_dimension_numbers<[1], [0], [0], [1], [0, 0, 1, 1], [], []>} : vector<16x32xf32>, vector<32x32xf32>, vector<16x32xf32> -> vector<16x32xf32>
    %c0_42 = arith.constant 0 : index
    %c0_43 = arith.constant 0 : index
    %c0_44 = arith.constant 0 : index
    %84 = vector.load %arg9[%c0_42, %c0_43, %c0_44] : memref<2x6x32xf32, #tpu.memory_space<vmem>>, vector<1x1x32xf32>
    %85 = vector.shape_cast %84 : vector<1x1x32xf32> to vector<1x32xf32>
    %86 = vector.broadcast %85 : vector<1x32xf32> to vector<16x32xf32>
    %87 = arith.addf %83, %86 : vector<16x32xf32>
    %88 = arith.addf %24, %87 : vector<16x32xf32>
    %c0_45 = arith.constant 0 : index
    %c1_46 = arith.constant 1 : index
    %c0_47 = arith.constant 0 : index
    %89 = vector.load %arg9[%c0_45, %c1_46, %c0_47] : memref<2x6x32xf32, #tpu.memory_space<vmem>>, vector<1x1x32xf32>
    %90 = vector.shape_cast %89 : vector<1x1x32xf32> to vector<1x32xf32>
    %c0_48 = arith.constant 0 : index
    %c2 = arith.constant 2 : index
    %c0_49 = arith.constant 0 : index
    %91 = vector.load %arg9[%c0_48, %c2, %c0_49] : memref<2x6x32xf32, #tpu.memory_space<vmem>>, vector<1x1x32xf32>
    %92 = vector.shape_cast %91 : vector<1x1x32xf32> to vector<1x32xf32>
    %cst_50 = arith.constant dense<0.000000e+00> : vector<16xf32>
    %93 = vector.multi_reduction <add>, %88, %cst_50 [1] : vector<16x32xf32> to vector<16xf32>
    %94 = vector.shape_cast %93 : vector<16xf32> to vector<16x1xf32>
    %cst_51 = arith.constant 3.200000e+01 : f32
    %95 = vector.broadcast %cst_51 : f32 to vector<16x1xf32>
    %96 = arith.divf %94, %95 : vector<16x1xf32>
    %97 = vector.broadcast %96 : vector<16x1xf32> to vector<16x32xf32>
    %98 = arith.subf %88, %97 : vector<16x32xf32>
    %99 = arith.mulf %98, %98 : vector<16x32xf32>
    %cst_52 = arith.constant dense<0.000000e+00> : vector<16xf32>
    %100 = vector.multi_reduction <add>, %99, %cst_52 [1] : vector<16x32xf32> to vector<16xf32>
    %101 = vector.shape_cast %100 : vector<16xf32> to vector<16x1xf32>
    %cst_53 = arith.constant 3.200000e+01 : f32
    %102 = vector.broadcast %cst_53 : f32 to vector<16x1xf32>
    %103 = arith.divf %101, %102 : vector<16x1xf32>
    %104 = vector.broadcast %96 : vector<16x1xf32> to vector<16x32xf32>
    %105 = arith.subf %88, %104 : vector<16x32xf32>
    %cst_54 = arith.constant 9.99999997E-7 : f32
    %106 = vector.broadcast %cst_54 : f32 to vector<16x1xf32>
    %107 = arith.addf %103, %106 : vector<16x1xf32>
    %108 = math.rsqrt %107 : vector<16x1xf32>
    %109 = vector.broadcast %108 : vector<16x1xf32> to vector<16x32xf32>
    %110 = arith.mulf %105, %109 : vector<16x32xf32>
    %111 = vector.broadcast %90 : vector<1x32xf32> to vector<16x32xf32>
    %112 = arith.mulf %110, %111 : vector<16x32xf32>
    %113 = vector.broadcast %92 : vector<1x32xf32> to vector<16x32xf32>
    %114 = arith.addf %112, %113 : vector<16x32xf32>
    %c0_55 = arith.constant 0 : index
    %c0_56 = arith.constant 0 : index
    %c0_57 = arith.constant 0 : index
    %115 = vector.load %arg6[%c0_55, %c0_56, %c0_57] : memref<2x32x64xf32, #tpu.memory_space<vmem>>, vector<1x32x64xf32>
    %116 = vector.shape_cast %115 : vector<1x32x64xf32> to vector<32x64xf32>
    %cst_58 = arith.constant dense<0.000000e+00> : vector<16x64xf32>
    %117 = tpu.matmul %114, %116, %cst_58 {dimension_numbers = #tpu.dot_dimension_numbers<[1], [0], [0], [1], [0, 0, 1, 1], [], []>} : vector<16x32xf32>, vector<32x64xf32>, vector<16x64xf32> -> vector<16x64xf32>
    %c0_59 = arith.constant 0 : index
    %c0_60 = arith.constant 0 : index
    %c0_61 = arith.constant 0 : index
    %118 = vector.load %arg7[%c0_59, %c0_60, %c0_61] : memref<2x1x64xf32, #tpu.memory_space<vmem>>, vector<1x1x64xf32>
    %119 = vector.shape_cast %118 : vector<1x1x64xf32> to vector<1x64xf32>
    %120 = vector.broadcast %119 : vector<1x64xf32> to vector<16x64xf32>
    %121 = arith.addf %117, %120 : vector<16x64xf32>
    %122 = arith.mulf %121, %121 : vector<16x64xf32>
    %123 = arith.mulf %121, %122 : vector<16x64xf32>
    %cst_62 = arith.constant 4.471500e-02 : f32
    %124 = vector.broadcast %cst_62 : f32 to vector<16x64xf32>
    %125 = arith.mulf %124, %123 : vector<16x64xf32>
    %126 = arith.addf %121, %125 : vector<16x64xf32>
    %cst_63 = arith.constant 0.797884583 : f32
    %127 = vector.broadcast %cst_63 : f32 to vector<16x64xf32>
    %128 = arith.mulf %127, %126 : vector<16x64xf32>
    %129 = math.tanh %128 : vector<16x64xf32>
    %cst_64 = arith.constant 1.000000e+00 : f32
    %130 = vector.broadcast %cst_64 : f32 to vector<16x64xf32>
    %131 = arith.addf %130, %129 : vector<16x64xf32>
    %cst_65 = arith.constant 5.000000e-01 : f32
    %132 = vector.broadcast %cst_65 : f32 to vector<16x64xf32>
    %133 = arith.mulf %132, %131 : vector<16x64xf32>
    %134 = arith.mulf %121, %133 : vector<16x64xf32>
    %c0_66 = arith.constant 0 : index
    %c0_67 = arith.constant 0 : index
    %c0_68 = arith.constant 0 : index
    %135 = vector.load %arg8[%c0_66, %c0_67, %c0_68] : memref<2x64x32xf32, #tpu.memory_space<vmem>>, vector<1x64x32xf32>
    %136 = vector.shape_cast %135 : vector<1x64x32xf32> to vector<64x32xf32>
    %cst_69 = arith.constant dense<0.000000e+00> : vector<16x32xf32>
    %137 = tpu.matmul %134, %136, %cst_69 {dimension_numbers = #tpu.dot_dimension_numbers<[1], [0], [0], [1], [0, 0, 1, 1], [], []>} : vector<16x64xf32>, vector<64x32xf32>, vector<16x32xf32> -> vector<16x32xf32>
    %c0_70 = arith.constant 0 : index
    %c3 = arith.constant 3 : index
    %c0_71 = arith.constant 0 : index
    %138 = vector.load %arg9[%c0_70, %c3, %c0_71] : memref<2x6x32xf32, #tpu.memory_space<vmem>>, vector<1x1x32xf32>
    %139 = vector.shape_cast %138 : vector<1x1x32xf32> to vector<1x32xf32>
    %140 = vector.broadcast %139 : vector<1x32xf32> to vector<16x32xf32>
    %141 = arith.addf %137, %140 : vector<16x32xf32>
    %142 = arith.addf %114, %141 : vector<16x32xf32>
    %c0_72 = arith.constant 0 : index
    %c4 = arith.constant 4 : index
    %c0_73 = arith.constant 0 : index
    %143 = vector.load %arg9[%c0_72, %c4, %c0_73] : memref<2x6x32xf32, #tpu.memory_space<vmem>>, vector<1x1x32xf32>
    %144 = vector.shape_cast %143 : vector<1x1x32xf32> to vector<1x32xf32>
    %c0_74 = arith.constant 0 : index
    %c5 = arith.constant 5 : index
    %c0_75 = arith.constant 0 : index
    %145 = vector.load %arg9[%c0_74, %c5, %c0_75] : memref<2x6x32xf32, #tpu.memory_space<vmem>>, vector<1x1x32xf32>
    %146 = vector.shape_cast %145 : vector<1x1x32xf32> to vector<1x32xf32>
    %cst_76 = arith.constant dense<0.000000e+00> : vector<16xf32>
    %147 = vector.multi_reduction <add>, %142, %cst_76 [1] : vector<16x32xf32> to vector<16xf32>
    %148 = vector.shape_cast %147 : vector<16xf32> to vector<16x1xf32>
    %cst_77 = arith.constant 3.200000e+01 : f32
    %149 = vector.broadcast %cst_77 : f32 to vector<16x1xf32>
    %150 = arith.divf %148, %149 : vector<16x1xf32>
    %151 = vector.broadcast %150 : vector<16x1xf32> to vector<16x32xf32>
    %152 = arith.subf %142, %151 : vector<16x32xf32>
    %153 = arith.mulf %152, %152 : vector<16x32xf32>
    %cst_78 = arith.constant dense<0.000000e+00> : vector<16xf32>
    %154 = vector.multi_reduction <add>, %153, %cst_78 [1] : vector<16x32xf32> to vector<16xf32>
    %155 = vector.shape_cast %154 : vector<16xf32> to vector<16x1xf32>
    %cst_79 = arith.constant 3.200000e+01 : f32
    %156 = vector.broadcast %cst_79 : f32 to vector<16x1xf32>
    %157 = arith.divf %155, %156 : vector<16x1xf32>
    %158 = vector.broadcast %150 : vector<16x1xf32> to vector<16x32xf32>
    %159 = arith.subf %142, %158 : vector<16x32xf32>
    %cst_80 = arith.constant 9.99999997E-7 : f32
    %160 = vector.broadcast %cst_80 : f32 to vector<16x1xf32>
    %161 = arith.addf %157, %160 : vector<16x1xf32>
    %162 = math.rsqrt %161 : vector<16x1xf32>
    %163 = vector.broadcast %162 : vector<16x1xf32> to vector<16x32xf32>
    %164 = arith.mulf %159, %163 : vector<16x32xf32>
    %165 = vector.broadcast %144 : vector<1x32xf32> to vector<16x32xf32>
    %166 = arith.mulf %164, %165 : vector<16x32xf32>
    %167 = vector.broadcast %146 : vector<1x32xf32> to vector<16x32xf32>
    %168 = arith.addf %166, %167 : vector<16x32xf32>
    %c1_81 = arith.constant 1 : index
    %c0_82 = arith.constant 0 : index
    %c0_83 = arith.constant 0 : index
    %169 = vector.load %arg3[%c1_81, %c0_82, %c0_83] : memref<2x32x96xf32, #tpu.memory_space<vmem>>, vector<1x32x96xf32>
    %170 = vector.shape_cast %169 : vector<1x32x96xf32> to vector<32x96xf32>
    %cst_84 = arith.constant dense<0.000000e+00> : vector<16x96xf32>
    %171 = tpu.matmul %168, %170, %cst_84 {dimension_numbers = #tpu.dot_dimension_numbers<[1], [0], [0], [1], [0, 0, 1, 1], [], []>} : vector<16x32xf32>, vector<32x96xf32>, vector<16x96xf32> -> vector<16x96xf32>
    %c1_85 = arith.constant 1 : index
    %c0_86 = arith.constant 0 : index
    %c0_87 = arith.constant 0 : index
    %172 = vector.load %arg4[%c1_85, %c0_86, %c0_87] : memref<2x1x96xf32, #tpu.memory_space<vmem>>, vector<1x1x96xf32>
    %173 = vector.shape_cast %172 : vector<1x1x96xf32> to vector<1x96xf32>
    %174 = vector.broadcast %173 : vector<1x96xf32> to vector<16x96xf32>
    %175 = arith.addf %171, %174 : vector<16x96xf32>
    %176 = vector.shape_cast %175 : vector<16x96xf32> to vector<2x8x96xf32>
    %177 = vector.extract_strided_slice %176 {offsets = [0, 0, 0], sizes = [2, 8, 16], strides = [1, 1, 1]} : vector<2x8x96xf32> to vector<2x8x16xf32>
    %178 = vector.extract_strided_slice %176 {offsets = [0, 0, 32], sizes = [2, 8, 16], strides = [1, 1, 1]} : vector<2x8x96xf32> to vector<2x8x16xf32>
    %179 = vector.extract_strided_slice %176 {offsets = [0, 0, 64], sizes = [2, 8, 16], strides = [1, 1, 1]} : vector<2x8x96xf32> to vector<2x8x16xf32>
    "tpu.trace_start"() <{level = 10 : i32, message = "bqd,bkd->bqk"}> : () -> ()
    %cst_88 = arith.constant dense<0.000000e+00> : vector<2x8x8xf32>
    %180 = tpu.matmul %177, %178, %cst_88 {dimension_numbers = #tpu.dot_dimension_numbers<[2], [2], [1], [1], [0, 0, 0, 1, 1, 1], [0], [0]>} : vector<2x8x16xf32>, vector<2x8x16xf32>, vector<2x8x8xf32> -> vector<2x8x8xf32>
    %cst_89 = arith.constant -1.000000e+09 : f32
    "tpu.trace_stop"() : () -> ()
    %181 = vector.broadcast %cst_89 : f32 to vector<2x8x8xf32>
    %182 = arith.select %30, %181, %180 : vector<2x8x8xi1>, vector<2x8x8xf32>
    %cst_90 = arith.constant dense<0xFF800000> : vector<2x8xf32>
    %183 = vector.multi_reduction <maximumf>, %182, %cst_90 [2] : vector<2x8x8xf32> to vector<2x8xf32>
    %184 = vector.shape_cast %183 : vector<2x8xf32> to vector<2x8x1xf32>
    %185 = vector.broadcast %184 : vector<2x8x1xf32> to vector<2x8x8xf32>
    %186 = arith.subf %182, %185 : vector<2x8x8xf32>
    %187 = math.exp %186 : vector<2x8x8xf32>
    %cst_91 = arith.constant dense<0.000000e+00> : vector<2x8xf32>
    %188 = vector.multi_reduction <add>, %187, %cst_91 [2] : vector<2x8x8xf32> to vector<2x8xf32>
    %189 = vector.shape_cast %188 : vector<2x8xf32> to vector<2x8x1xf32>
    %190 = tpu.reciprocal %189 : vector<2x8x1xf32> -> vector<2x8x1xf32>
    %191 = vector.broadcast %190 : vector<2x8x1xf32> to vector<2x8x8xf32>
    %192 = arith.mulf %187, %191 : vector<2x8x8xf32>
    %c1_92 = arith.constant 1 : index
    %c0_93 = arith.constant 0 : index
    %c0_94 = arith.constant 0 : index
    %c0_95 = arith.constant 0 : index
    %c0_96 = arith.constant 0 : index
    %193 = vector.load %arg11[%c1_92, %c0_93, %c0_94, %c0_95, %c0_96] : memref<2x2x2x8x8xf32, #tpu.memory_space<vmem>>, vector<1x1x2x8x8xf32>
    %194 = vector.shape_cast %193 : vector<1x1x2x8x8xf32> to vector<2x8x8xf32>
    %195 = vector.shape_cast %192 : vector<2x8x8xf32> to vector<1x1x2x8x8xf32>
    tpu.vector_store %arg11[%c1_92, %c0_93, %c0_94, %c0_95, %c0_96], %195 {strides = array<i32>} : memref<2x2x2x8x8xf32, #tpu.memory_space<vmem>>, vector<1x1x2x8x8xf32>,
    "tpu.trace_start"() <{level = 10 : i32, message = "bqk,bkd->bqd"}> : () -> ()
    %cst_97 = arith.constant dense<0.000000e+00> : vector<2x8x16xf32>
    %196 = tpu.matmul %192, %179, %cst_97 {dimension_numbers = #tpu.dot_dimension_numbers<[2], [1], [1], [2], [0, 0, 0, 1, 1, 2], [0], [0]>} : vector<2x8x8xf32>, vector<2x8x16xf32>, vector<2x8x16xf32> -> vector<2x8x16xf32>
    "tpu.trace_stop"() : () -> ()
    %197 = vector.extract_strided_slice %176 {offsets = [0, 0, 16], sizes = [2, 8, 16], strides = [1, 1, 1]} : vector<2x8x96xf32> to vector<2x8x16xf32>
    %198 = vector.extract_strided_slice %176 {offsets = [0, 0, 48], sizes = [2, 8, 16], strides = [1, 1, 1]} : vector<2x8x96xf32> to vector<2x8x16xf32>
    %199 = vector.extract_strided_slice %176 {offsets = [0, 0, 80], sizes = [2, 8, 16], strides = [1, 1, 1]} : vector<2x8x96xf32> to vector<2x8x16xf32>
    "tpu.trace_start"() <{level = 10 : i32, message = "bqd,bkd->bqk"}> : () -> ()
    %cst_98 = arith.constant dense<0.000000e+00> : vector<2x8x8xf32>
    %200 = tpu.matmul %197, %198, %cst_98 {dimension_numbers = #tpu.dot_dimension_numbers<[2], [2], [1], [1], [0, 0, 0, 1, 1, 1], [0], [0]>} : vector<2x8x16xf32>, vector<2x8x16xf32>, vector<2x8x8xf32> -> vector<2x8x8xf32>
    %cst_99 = arith.constant -1.000000e+09 : f32
    "tpu.trace_stop"() : () -> ()
    %201 = vector.broadcast %cst_99 : f32 to vector<2x8x8xf32>
    %202 = arith.select %30, %201, %200 : vector<2x8x8xi1>, vector<2x8x8xf32>
    %cst_100 = arith.constant dense<0xFF800000> : vector<2x8xf32>
    %203 = vector.multi_reduction <maximumf>, %202, %cst_100 [2] : vector<2x8x8xf32> to vector<2x8xf32>
    %204 = vector.shape_cast %203 : vector<2x8xf32> to vector<2x8x1xf32>
    %205 = vector.broadcast %204 : vector<2x8x1xf32> to vector<2x8x8xf32>
    %206 = arith.subf %202, %205 : vector<2x8x8xf32>
    %207 = math.exp %206 : vector<2x8x8xf32>
    %cst_101 = arith.constant dense<0.000000e+00> : vector<2x8xf32>
    %208 = vector.multi_reduction <add>, %207, %cst_101 [2] : vector<2x8x8xf32> to vector<2x8xf32>
    %209 = vector.shape_cast %208 : vector<2x8xf32> to vector<2x8x1xf32>
    %210 = tpu.reciprocal %209 : vector<2x8x1xf32> -> vector<2x8x1xf32>
    %211 = vector.broadcast %210 : vector<2x8x1xf32> to vector<2x8x8xf32>
    %212 = arith.mulf %207, %211 : vector<2x8x8xf32>
    %c1_102 = arith.constant 1 : index
    %c1_103 = arith.constant 1 : index
    %c0_104 = arith.constant 0 : index
    %c0_105 = arith.constant 0 : index
    %c0_106 = arith.constant 0 : index
    %213 = vector.load %arg11[%c1_102, %c1_103, %c0_104, %c0_105, %c0_106] : memref<2x2x2x8x8xf32, #tpu.memory_space<vmem>>, vector<1x1x2x8x8xf32>
    %214 = vector.shape_cast %213 : vector<1x1x2x8x8xf32> to vector<2x8x8xf32>
    %215 = vector.shape_cast %212 : vector<2x8x8xf32> to vector<1x1x2x8x8xf32>
    tpu.vector_store %arg11[%c1_102, %c1_103, %c0_104, %c0_105, %c0_106], %215 {strides = array<i32>} : memref<2x2x2x8x8xf32, #tpu.memory_space<vmem>>, vector<1x1x2x8x8xf32>,
    "tpu.trace_start"() <{level = 10 : i32, message = "bqk,bkd->bqd"}> : () -> ()
    %cst_107 = arith.constant dense<0.000000e+00> : vector<2x8x16xf32>
    %216 = tpu.matmul %212, %199, %cst_107 {dimension_numbers = #tpu.dot_dimension_numbers<[2], [1], [1], [2], [0, 0, 0, 1, 1, 2], [0], [0]>} : vector<2x8x8xf32>, vector<2x8x16xf32>, vector<2x8x16xf32> -> vector<2x8x16xf32>
    "tpu.trace_stop"() : () -> ()
    %217 = tpu.concatenate %196, %216 in 2 : vector<2x8x16xf32>, vector<2x8x16xf32> -> vector<2x8x32xf32>
    %218 = vector.shape_cast %217 : vector<2x8x32xf32> to vector<16x32xf32>
    %c1_108 = arith.constant 1 : index
    %c0_109 = arith.constant 0 : index
    %c0_110 = arith.constant 0 : index
    %219 = vector.load %arg5[%c1_108, %c0_109, %c0_110] : memref<2x32x32xf32, #tpu.memory_space<vmem>>, vector<1x32x32xf32>
    %220 = vector.shape_cast %219 : vector<1x32x32xf32> to vector<32x32xf32>
    %cst_111 = arith.constant dense<0.000000e+00> : vector<16x32xf32>
    %221 = tpu.matmul %218, %220, %cst_111 {dimension_numbers = #tpu.dot_dimension_numbers<[1], [0], [0], [1], [0, 0, 1, 1], [], []>} : vector<16x32xf32>, vector<32x32xf32>, vector<16x32xf32> -> vector<16x32xf32>
    %c1_112 = arith.constant 1 : index
    %c0_113 = arith.constant 0 : index
    %c0_114 = arith.constant 0 : index
    %222 = vector.load %arg9[%c1_112, %c0_113, %c0_114] : memref<2x6x32xf32, #tpu.memory_space<vmem>>, vector<1x1x32xf32>
    %223 = vector.shape_cast %222 : vector<1x1x32xf32> to vector<1x32xf32>
    %224 = vector.broadcast %223 : vector<1x32xf32> to vector<16x32xf32>
    %225 = arith.addf %221, %224 : vector<16x32xf32>
    %226 = arith.addf %168, %225 : vector<16x32xf32>
    %c1_115 = arith.constant 1 : index
    %c1_116 = arith.constant 1 : index
    %c0_117 = arith.constant 0 : index
    %227 = vector.load %arg9[%c1_115, %c1_116, %c0_117] : memref<2x6x32xf32, #tpu.memory_space<vmem>>, vector<1x1x32xf32>
    %228 = vector.shape_cast %227 : vector<1x1x32xf32> to vector<1x32xf32>
    %c1_118 = arith.constant 1 : index
    %c2_119 = arith.constant 2 : index
    %c0_120 = arith.constant 0 : index
    %229 = vector.load %arg9[%c1_118, %c2_119, %c0_120] : memref<2x6x32xf32, #tpu.memory_space<vmem>>, vector<1x1x32xf32>
    %230 = vector.shape_cast %229 : vector<1x1x32xf32> to vector<1x32xf32>
    %cst_121 = arith.constant dense<0.000000e+00> : vector<16xf32>
    %231 = vector.multi_reduction <add>, %226, %cst_121 [1] : vector<16x32xf32> to vector<16xf32>
    %232 = vector.shape_cast %231 : vector<16xf32> to vector<16x1xf32>
    %cst_122 = arith.constant 3.200000e+01 : f32
    %233 = vector.broadcast %cst_122 : f32 to vector<16x1xf32>
    %234 = arith.divf %232, %233 : vector<16x1xf32>
    %235 = vector.broadcast %234 : vector<16x1xf32> to vector<16x32xf32>
    %236 = arith.subf %226, %235 : vector<16x32xf32>
    %237 = arith.mulf %236, %236 : vector<16x32xf32>
    %cst_123 = arith.constant dense<0.000000e+00> : vector<16xf32>
    %238 = vector.multi_reduction <add>, %237, %cst_123 [1] : vector<16x32xf32> to vector<16xf32>
    %239 = vector.shape_cast %238 : vector<16xf32> to vector<16x1xf32>
    %cst_124 = arith.constant 3.200000e+01 : f32
    %240 = vector.broadcast %cst_124 : f32 to vector<16x1xf32>
    %241 = arith.divf %239, %240 : vector<16x1xf32>
    %242 = vector.broadcast %234 : vector<16x1xf32> to vector<16x32xf32>
    %243 = arith.subf %226, %242 : vector<16x32xf32>
    %cst_125 = arith.constant 9.99999997E-7 : f32
    %244 = vector.broadcast %cst_125 : f32 to vector<16x1xf32>
    %245 = arith.addf %241, %244 : vector<16x1xf32>
    %246 = math.rsqrt %245 : vector<16x1xf32>
    %247 = vector.broadcast %246 : vector<16x1xf32> to vector<16x32xf32>
    %248 = arith.mulf %243, %247 : vector<16x32xf32>
    %249 = vector.broadcast %228 : vector<1x32xf32> to vector<16x32xf32>
    %250 = arith.mulf %248, %249 : vector<16x32xf32>
    %251 = vector.broadcast %230 : vector<1x32xf32> to vector<16x32xf32>
    %252 = arith.addf %250, %251 : vector<16x32xf32>
    %c1_126 = arith.constant 1 : index
    %c0_127 = arith.constant 0 : index
    %c0_128 = arith.constant 0 : index
    %253 = vector.load %arg6[%c1_126, %c0_127, %c0_128] : memref<2x32x64xf32, #tpu.memory_space<vmem>>, vector<1x32x64xf32>
    %254 = vector.shape_cast %253 : vector<1x32x64xf32> to vector<32x64xf32>
    %cst_129 = arith.constant dense<0.000000e+00> : vector<16x64xf32>
    %255 = tpu.matmul %252, %254, %cst_129 {dimension_numbers = #tpu.dot_dimension_numbers<[1], [0], [0], [1], [0, 0, 1, 1], [], []>} : vector<16x32xf32>, vector<32x64xf32>, vector<16x64xf32> -> vector<16x64xf32>
    %c1_130 = arith.constant 1 : index
    %c0_131 = arith.constant 0 : index
    %c0_132 = arith.constant 0 : index
    %256 = vector.load %arg7[%c1_130, %c0_131, %c0_132] : memref<2x1x64xf32, #tpu.memory_space<vmem>>, vector<1x1x64xf32>
    %257 = vector.shape_cast %256 : vector<1x1x64xf32> to vector<1x64xf32>
    %258 = vector.broadcast %257 : vector<1x64xf32> to vector<16x64xf32>
    %259 = arith.addf %255, %258 : vector<16x64xf32>
    %260 = arith.mulf %259, %259 : vector<16x64xf32>
    %261 = arith.mulf %259, %260 : vector<16x64xf32>
    %cst_133 = arith.constant 4.471500e-02 : f32
    %262 = vector.broadcast %cst_133 : f32 to vector<16x64xf32>
    %263 = arith.mulf %262, %261 : vector<16x64xf32>
    %264 = arith.addf %259, %263 : vector<16x64xf32>
    %cst_134 = arith.constant 0.797884583 : f32
    %265 = vector.broadcast %cst_134 : f32 to vector<16x64xf32>
    %266 = arith.mulf %265, %264 : vector<16x64xf32>
    %267 = math.tanh %266 : vector<16x64xf32>
    %cst_135 = arith.constant 1.000000e+00 : f32
    %268 = vector.broadcast %cst_135 : f32 to vector<16x64xf32>
    %269 = arith.addf %268, %267 : vector<16x64xf32>
    %cst_136 = arith.constant 5.000000e-01 : f32
    %270 = vector.broadcast %cst_136 : f32 to vector<16x64xf32>
    %271 = arith.mulf %270, %269 : vector<16x64xf32>
    %272 = arith.mulf %259, %271 : vector<16x64xf32>
    %c1_137 = arith.constant 1 : index
    %c0_138 = arith.constant 0 : index
    %c0_139 = arith.constant 0 : index
    %273 = vector.load %arg8[%c1_137, %c0_138, %c0_139] : memref<2x64x32xf32, #tpu.memory_space<vmem>>, vector<1x64x32xf32>
    %274 = vector.shape_cast %273 : vector<1x64x32xf32> to vector<64x32xf32>
    %cst_140 = arith.constant dense<0.000000e+00> : vector<16x32xf32>
    %275 = tpu.matmul %272, %274, %cst_140 {dimension_numbers = #tpu.dot_dimension_numbers<[1], [0], [0], [1], [0, 0, 1, 1], [], []>} : vector<16x64xf32>, vector<64x32xf32>, vector<16x32xf32> -> vector<16x32xf32>
    %c1_141 = arith.constant 1 : index
    %c3_142 = arith.constant 3 : index
    %c0_143 = arith.constant 0 : index
    %276 = vector.load %arg9[%c1_141, %c3_142, %c0_143] : memref<2x6x32xf32, #tpu.memory_space<vmem>>, vector<1x1x32xf32>
    %277 = vector.shape_cast %276 : vector<1x1x32xf32> to vector<1x32xf32>
    %278 = vector.broadcast %277 : vector<1x32xf32> to vector<16x32xf32>
    %279 = arith.addf %275, %278 : vector<16x32xf32>
    %280 = arith.addf %252, %279 : vector<16x32xf32>
    %c1_144 = arith.constant 1 : index
    %c4_145 = arith.constant 4 : index
    %c0_146 = arith.constant 0 : index
    %281 = vector.load %arg9[%c1_144, %c4_145, %c0_146] : memref<2x6x32xf32, #tpu.memory_space<vmem>>, vector<1x1x32xf32>
    %282 = vector.shape_cast %281 : vector<1x1x32xf32> to vector<1x32xf32>
    %c1_147 = arith.constant 1 : index
    %c5_148 = arith.constant 5 : index
    %c0_149 = arith.constant 0 : index
    %283 = vector.load %arg9[%c1_147, %c5_148, %c0_149] : memref<2x6x32xf32, #tpu.memory_space<vmem>>, vector<1x1x32xf32>
    %284 = vector.shape_cast %283 : vector<1x1x32xf32> to vector<1x32xf32>
    %cst_150 = arith.constant dense<0.000000e+00> : vector<16xf32>
    %285 = vector.multi_reduction <add>, %280, %cst_150 [1] : vector<16x32xf32> to vector<16xf32>
    %286 = vector.shape_cast %285 : vector<16xf32> to vector<16x1xf32>
    %cst_151 = arith.constant 3.200000e+01 : f32
    %287 = vector.broadcast %cst_151 : f32 to vector<16x1xf32>
    %288 = arith.divf %286, %287 : vector<16x1xf32>
    %289 = vector.broadcast %288 : vector<16x1xf32> to vector<16x32xf32>
    %290 = arith.subf %280, %289 : vector<16x32xf32>
    %291 = arith.mulf %290, %290 : vector<16x32xf32>
    %cst_152 = arith.constant dense<0.000000e+00> : vector<16xf32>
    %292 = vector.multi_reduction <add>, %291, %cst_152 [1] : vector<16x32xf32> to vector<16xf32>
    %293 = vector.shape_cast %292 : vector<16xf32> to vector<16x1xf32>
    %cst_153 = arith.constant 3.200000e+01 : f32
    %294 = vector.broadcast %cst_153 : f32 to vector<16x1xf32>
    %295 = arith.divf %293, %294 : vector<16x1xf32>
    %296 = vector.broadcast %288 : vector<16x1xf32> to vector<16x32xf32>
    %297 = arith.subf %280, %296 : vector<16x32xf32>
    %cst_154 = arith.constant 9.99999997E-7 : f32
    %298 = vector.broadcast %cst_154 : f32 to vector<16x1xf32>
    %299 = arith.addf %295, %298 : vector<16x1xf32>
    %300 = math.rsqrt %299 : vector<16x1xf32>
    %301 = vector.broadcast %300 : vector<16x1xf32> to vector<16x32xf32>
    %302 = arith.mulf %297, %301 : vector<16x32xf32>
    %303 = vector.broadcast %282 : vector<1x32xf32> to vector<16x32xf32>
    %304 = arith.mulf %302, %303 : vector<16x32xf32>
    %305 = vector.broadcast %284 : vector<1x32xf32> to vector<16x32xf32>
    %306 = arith.addf %304, %305 : vector<16x32xf32>
    %c0_155 = arith.constant 0 : index
    %c0_156 = arith.constant 0 : index
    %307 = vector.load %arg10[%c0_155, %c0_156] : memref<16x32xf32, #tpu.memory_space<vmem>>, vector<16x32xf32>
    tpu.vector_store %arg10[%c0_155, %c0_156], %306 {strides = array<i32>} : memref<16x32xf32, #tpu.memory_space<vmem>>, vector<16x32xf32>,
    return
  }
}

</mosaic_0001>

<bundles_post_ra>
// kernel: tpu_custom_call.1
= control target key start
LH: loop header
LB: loop body
LE: loop exit
PB: predicated region body
PF: predicated region fallthrough
CT: control target
= control target key end

     0   :  { %17 = vsyncpa [#allocation3], 0  ;;  %vm43_vm0 = vcmask 261120   ;;  %s3554_s0 = inlined_call_operand.vmem [shape: f32[16,32], index: 0, kind: input, shape index: {}]   ;;  %s3555_s1 = inlined_call_operand.vmem [shape: f32[2,8], index: 1, kind: input, shape index: {}]   ;;  %s3556_s2 = inlined_call_operand.vmem [shape: f32[2,32], index: 2, kind: input, shape index: {}]   ;;  %s3557_s3 = inlined_call_operand.vmem [shape: f32[2,32,96], index: 3, kind: input, shape index: {}]   ;;  %s3558_s4 = inlined_call_operand.vmem [shape: f32[2,1,96], index: 4, kind: input, shape index: {}]   ;;  %s3559_s5 = inlined_call_operand.vmem [shape: f32[2,32,32], index: 5, kind: input, shape index: {}]   ;;  %s3560_s6 = inlined_call_operand.vmem [shape: f32[2,32,64], index: 6, kind: input, shape index: {}]   ;;  %s3561_s7 = inlined_call_operand.vmem [shape: f32[2,1,64], index: 7, kind: input, shape index: {}]   ;;  %s3562_s8 = inlined_call_operand.vmem [shape: f32[2,64,32], index: 8, kind: input, shape index: {}]   ;;  %s3563_s9 = inlined_call_operand.vmem [shape: f32[2,6,32], index: 9, kind: input, shape index: {}]   ;;  %s3564_s10 = inlined_call_operand.hbm [shape: f32[16,32], index: 10, kind: output, shape index: {0}]   ;;  %s3565_s11 = inlined_call_operand.hbm [shape: f32[2,2,2,8,8], index: 11, kind: output, shape index: {1}]  }
   0x1   :  { %v39_v0 = vld [vmem:[%s3554_s0] sm:$0xff]  ;;  %v40_v1 = vld [vmem:[%s3554_s0 + $0x8] sm:$0xff] }
   0x2   :  { %18 = vsyncpa [#allocation5], 0  ;;  %v44_v2 = vsel %vm43_vm0, %v39_v0, 0.0  ;;  %v47_v3 = vsel %vm43_vm0, %v40_v1, 0.0  ;;  %v123_v14 = vld [vmem:[%s3557_s3] sm:$0xff]  ;;  %v124_v15 = vld [vmem:[%s3557_s3 + $0x8] sm:$0xff]  ;;  %v96_v46 = vlaneseq }
   0x3   :  { %45 = vadd.xlane.f32.xlu0 %v44_v2  ;;  %v125_v16 = vld [vmem:[%s3557_s3 + $0x10] sm:$0xff]  ;;  %v2821_v17 = vpack.c.bf16 %v124_v15, %v123_v14  ;;  %v126_v18 = vld [vmem:[%s3557_s3 + $0x18] sm:$0xff]  ;;  %v2462_v27 = vld [vmem:[%s3556_s2] ss:$0 sm:$0xff]  ;;  %v3023_v36 = vmov 0.0   ;;  %vm3024_vm1 = vmmov 0  }
   0x4   :  { %v2825_v19 = vpack.c.bf16 %v126_v18, %v125_v16  ;;  %v2463_v29 = vld [vmem:[%s3556_s2 + $0x1] ss:$0 sm:$0xff]  ;;  %2658 = vmatprep.subr.mxu0 %v3023_v36  ;;  %2660 = vmatprep.mubr.msk.f32.mxu0 %vm3024_vm1, %v3023_v36  ;;  %v2465_v37 = vld [vmem:[%s3558_s4] ss:$0 sm:$0xff]  ;;  %s3025_s14 = smov 96   ;;  %vm218_vm2 = vcmask 130048  }
   0x5   :  { %2822 = vmatprep.subr.bf16.mxu1 %v2821_v17  ;;  %v3026_v44 = vmov 1966171168   ;;  %v97_v48 = vshrl.u32 %v96_v46, 7  ;;  %v3027_v55 = vmov 0   ;;  %vm372_vm6 = vcmask 64512   ;;  %s3029_s17 = smov 80  }
   0x6   :  { %2824 = vmatpush3.bf16.msra.mxu1 %v2821_v17  ;;  %v94_v45 = vunpack.c.l.s4 %v3026_v44  ;;  %v2464_v50 = vld.sshfl [vmem:[%s3555_s1] sm:$0x11 pattern:$0x75316420]  ;;  %s3028_s1 = smov 64   ;;  %s3030_s18 = smov 112  }
   0x7   :  { %48 = vadd.xlane.f32.xlu0 %v47_v3  ;;  %2826 = vmatprep.subr.bf16.mxu1 %v2825_v19  ;;  %v92_v52 = vcombine.high %v2464_v50, %v2464_v50  ;;  %v115_v54 = vsub.s32 0, %v97_v48  ;;  %s3031_s19 = smov 48   ;;  %s3032_s27 = smov 16   ;;  %vm1149_vm8 = vcmask 523264  }
   0x8   :  { %v95_v47 = vunpack.c.0.s8 %v94_v45  ;;  %s3033_s13 = smov [#allocation4]  }
   0x9   :  { %s2447_s15 = sshll.u32 %s3033_s13, 4  ;;  %s2448_s15 = int_to_ptr.vmem [resolvable:$true] %s2447_s15 }
   0xa   :  { %2828 = vmatpush3.bf16.msra.mxu1 %v2825_v19  ;;  %v98_v49 = vsub.s32 %v95_v47, %v97_v48  ;;  %s2975_s16 = scalar_lea.vmem %s2448_s15, 1024  ;;  %p2980_p1 = scmp.lt.s32.totalorder %s2448_s15, %s2448_s15 }
   0xb   :  { %2648 = vmatprep.subr.mxu1 %v3023_v36  ;;  %p2976_p0 = scmp.ne.s32.totalorder %s2448_s15, %s2975_s16  ;;  %p2981_p2 = scmp.lt.s32.totalorder %s2975_s16, %s2975_s16 }
   0xc   :  { %v99_v51 = vrot.slane %v2464_v50, %v98_v49  ;;  %v106_v53 = vrot.slane %v92_v52, %v98_v49 }
   0xd   :  { %p2982_p3 = por %p2981_p2, %p2980_p1 }
   0xe   :  { %vm109_vm3 = vcmp.gt.f32.partialorder %v99_v51, 0.5  ;;  %vm110_vm4 = vcmp.gt.f32.partialorder %v106_v53, 0.5 }
   0xf   :  { %v111_v56 = vsel %vm109_vm3, 1, %v3027_v55  ;;  %v112_v58 = vsel %vm110_vm4, 1, %v3027_v55  ;;  %p2983_p4 = pnand %p2982_p3, %p2976_p0 }
  0x10   :  { %v3165_v57 = vrot.slane %v111_v56, %v115_v54  ;;  %v3168_v59 = vrot.slane %v112_v58, %v115_v54 }
  0x12   :  { %vm121_vm5 = vcmp.eq.s32.totalorder %v3165_v57, 1  ;;  %vm122_vm7 = vcmp.eq.s32.totalorder %v3168_v59, 1 }
  0x90   :  { %v46_v4 = vpop.xlane.xlu0 %45 }
  0x91   :  { %v51_v5 = vmul.f32 0.03125, %v46_v4 }
  0x93   :  { %v53_v6 = vsub.f32 %v39_v0, %v51_v5 }
  0x94   :  { %v49_v7 = vpop.xlane.xlu0 %48 }
  0x95   :  { %v52_v8 = vmul.f32 0.03125, %v49_v7  ;;  %v55_v9 = vmul.f32 %v53_v6, %v53_v6 }
  0x97   :  { %v54_v10 = vsub.f32 %v40_v1, %v52_v8  ;;  %v57_v11 = vsel %vm43_vm0, %v55_v9, 0.0 }
  0x98   :  { %58 = vadd.xlane.f32.xlu1 %v57_v11 }
  0x99   :  { %v56_v12 = vmul.f32 %v54_v10, %v54_v10 }
  0x9b   :  { %v60_v13 = vsel %vm43_vm0, %v56_v12, 0.0 }
  0x9c   :  { %61 = vadd.xlane.f32.xlu1 %v60_v13 }
 0x125   :  { %v59_v20 = vpop.xlane.xlu1 %58 }
 0x126   :  { %v63_v21 = vmul.f32 0.03125, %v59_v20 }
 0x128   :  { %v65_v22 = vadd.f32 1e-06, %v63_v21 }
 0x129   :  { %v62_v23 = vpop.xlane.xlu1 %61 }
 0x12a   :  { %2915 = vrsqrt.f32 %v65_v22  ;;  %v64_v24 = vmul.f32 0.03125, %v62_v23 }
 0x12c   :  { %v66_v25 = vadd.f32 1e-06, %v64_v24 }
 0x12e   :  { %2917 = vrsqrt.f32 %v66_v25 }
 0x134   :  { %v2916_v26 = vpop.eup %2915 }
 0x135   :  { %v69_v28 = vmul.f32 %v2916_v26, %v53_v6 }
 0x137   :  { %v75_v30 = vmul.f32 %v2462_v27, %v69_v28 }
 0x138   :  { %v2918_v31 = vpop.eup %2917 }
 0x139   :  { %v70_v32 = vmul.f32 %v2918_v31, %v54_v10  ;;  %v3125_v33 = vadd.f32 %v2463_v29, %v75_v30 }
 0x13b   :  { %v76_v34 = vmul.f32 %v2462_v27, %v70_v32  ;;  %2645 = vmatprep.mubr.msk.f32.mxu1 %vm43_vm0, %v3125_v33 }
 0x13d   :  { %v3129_v35 = vadd.f32 %v2463_v29, %v76_v34 }
 0x13f   :  { %2646 = vmatmul.mubr.msk.f32.vlgmr.msra.gmra.mrb[0].mxu1 %vm43_vm0, %v3129_v35 }
 0x140   :  { %2650 = vmatprep.mubr.msk.f32.mxu1 %vm3024_vm1, %v3023_v36 }
 0x212   :  { %v2647_v38 = vpop.f32.mrb[0].mxu1 }
 0x213   :  { %v3142_v39 = vadd.f32 %v2647_v38, %v2465_v37  ;;  %v206_v40 = vpop.f32.mrb[1].mxu1 }
 0x214   :  { %v3144_v41 = vadd.f32 %v2465_v37, %v206_v40 }
 0x215   :  { %294 = vrot.lane.b32.xlu1 %v3142_v39, %s3025_s14 }
 0x216   :  { %216 = vrot.lane.b32.xlu0 %v3144_v41, %s3025_s14 }
 0x287   :  { %v295_v43 = vpop.permute.xlu1 %294 }
 0x288   :  { %v217_v42 = vpop.permute.xlu0 %216 }
 0x289   :  { %2649 = vmatpush3.xpose.msk.msra.mxu1 %vm218_vm2, %v217_v42 }
 0x28a   :  { %2653 = vmatprep.subr.mxu1 %v3023_v36 }
 0x28c   :  { %2651 = vmatmul.mubr.msk.f32.vlgmr.msra.gmra.mrb[2].mxu1 %vm218_vm2, %v3144_v41 }
 0x28d   :  { %2654 = vmatpush3.xpose.msk.msra.mxu1 %vm218_vm2, %v295_v43  ;;  %2655 = vmatprep.mubr.msk.f32.mxu1 %vm3024_vm1, %v3023_v36 }
 0x28e   :  { %2663 = vmatprep.subr.mxu1 %v3023_v36 }
 0x290   :  { %2656 = vmatmul.mubr.msk.f32.vlgmr.msra.gmra.mrb[4].mxu1 %vm218_vm2, %v3142_v39 }
 0x291   :  { %2665 = vmatprep.mubr.msk.f32.mxu1 %vm3024_vm1, %v3023_v36 }
 0x35f   :  { %v289_v60 = vpop.f32.mrb[2].mxu1 }
 0x360   :  { %v370_v61 = vsel %vm121_vm5, -1e+09, %v289_v60  ;;  %v2652_v62 = vpop.f32.mrb[3].mxu1 }
 0x361   :  { %v373_v63 = vsel %vm372_vm6, %v370_v61, -inf  ;;  %v895_v62 = vld [vmem:[%s3559_s5 + $0x8] sm:$0xff] }
 0x362   :  { %374 = vmax.xlane.f32.xlu1 %v373_v63 }
 0x363   :  { %v366_v0 = vpop.f32.mrb[4].mxu1 }
 0x364   :  { %v371_v1 = vsel %vm122_vm7, -1e+09, %v366_v0  ;;  %v2657_v2 = vpop.f32.mrb[5].mxu1  ;;  %v896_v0 = vld [vmem:[%s3559_s5 + $0x10] sm:$0xff] }
 0x365   :  { %v376_v3 = vsel %vm372_vm6, %v371_v1, -inf }
 0x366   :  { %377 = vmax.xlane.f32.xlu0 %v376_v3 }
 0x373   :  { %473 = vrot.lane.b32.xlu1 %v3142_v39, %s3028_s1 }
 0x377   :  { %551 = vrot.lane.b32.xlu1 %v3144_v41, %s3029_s17 }
 0x37b   :  { %629 = vrot.lane.b32.xlu1 %v3142_v39, %s3029_s17 }
 0x37c   :  { %397 = vrot.lane.b32.xlu0 %v3144_v41, %s3028_s1 }
 0x3ef   :  { %v375_v4 = vpop.xlane.xlu1 %374 }
 0x3f0   :  { %v379_v5 = vsub.f32 %v370_v61, %v375_v4 }
 0x3f2   :  { %v381_v6 = vmul.f32 1.442695, %v379_v5 }
 0x3f3   :  { %v474_v7 = vpop.permute.xlu1 %473  ;;  %v378_v8 = vpop.xlane.xlu0 %377 }
 0x3f4   :  { %2919 = vpow2.f32 %v381_v6  ;;  %v380_v9 = vsub.f32 %v371_v1, %v378_v8  ;;  %2664 = vmatpush3.msra.mxu1 %v474_v7  ;;  %v897_v1 = vld [vmem:[%s3559_s5 + $0x18] sm:$0xff] }
 0x3f5   :  { %2673 = vmatprep.subr.mxu1 %v3023_v36  ;;  %v2833_v2 = vpack.c.bf16 %v897_v1, %v896_v0  ;;  %v1142_v0 = vld [vmem:[%s3562_s8 + $0x30] sm:$0xff]  ;;  %v1143_v1 = vld [vmem:[%s3562_s8 + $0x38] sm:$0xff] }
 0x3f6   :  { %v383_v10 = vmul.f32 1.442695, %v380_v9 }
 0x3f7   :  { %v398_v11 = vpop.permute.xlu0 %397  ;;  %v552_v16 = vpop.permute.xlu1 %551 }
 0x3f8   :  { %2921 = vpow2.f32 %v383_v10  ;;  %2659 = vmatpush3.msra.mxu0 %v398_v11  ;;  %v2480_v11 = vld [vmem:[%s3563_s9] ss:$0 sm:$0xff] }
 0x3f9   :  { %2668 = vmatprep.subr.mxu0 %v3023_v36 }
 0x3fb   :  { %v630_v17 = vpop.permute.xlu1 %629 }
 0x3fe   :  { %v2920_v12 = vpop.eup %2919 }
 0x3ff   :  { %v385_v13 = vsel %vm372_vm6, %v2920_v12, 0.0 }
 0x400   :  { %386 = vadd.xlane.f32.xlu0 %v385_v13 }
 0x402   :  { %v2922_v14 = vpop.eup %2921 }
 0x403   :  { %v388_v15 = vsel %vm372_vm6, %v2922_v14, 0.0 }
 0x404   :  { %389 = vadd.xlane.f32.xlu1 %v388_v15 }
 0x415   :  { %627 = vrot.lane.b32.xlu1 %v3142_v39, %s3030_s18 }
 0x416   :  { %549 = vrot.lane.b32.xlu0 %v3144_v41, %s3030_s18 }
 0x48d   :  { %v387_v18 = vpop.xlane.xlu0 %386 }
 0x48e   :  { %2923 = vrcp.f32 %v387_v18 }
 0x491   :  { %v390_v19 = vpop.xlane.xlu1 %389  ;;  %v550_v24 = vpop.permute.xlu0 %549 }
 0x492   :  { %2925 = vrcp.f32 %v390_v19 }
 0x495   :  { %v628_v25 = vpop.permute.xlu1 %627 }
 0x498   :  { %v2924_v20 = vpop.eup %2923 }
 0x499   :  { %v393_v21 = vmul.f32 %v2924_v20, %v2920_v12 }
 0x49b   :  { %395 = vst.msk [vmem:[#allocation4] sm:$0xff] %vm372_vm6, %v393_v21  ;;  %2661 = vmatmul.mubr.msk.f32.vlgmr.msra.gmra.mrb[0].mxu0 %vm372_vm6, %v393_v21 }
 0x49c   :  { %v2926_v22 = vpop.eup %2925  ;;  %2669 = vmatpush3.xpose.msk.msra.mxu0 %vm218_vm2, %v552_v16  ;;  %2670 = vmatprep.mubr.msk.f32.mxu0 %vm3024_vm1, %v3023_v36 }
 0x49d   :  { %v394_v23 = vmul.f32 %v2926_v22, %v2922_v14  ;;  %2678 = vmatprep.subr.mxu0 %v3023_v36 }
 0x49f   :  { %396 = vst.msk [vmem:[#allocation4 + $0x8] sm:$0xff] %vm372_vm6, %v394_v23  ;;  %2666 = vmatmul.mubr.msk.f32.vlgmr.msra.gmra.mrb[6].mxu1 %vm372_vm6, %v394_v23  ;;  %2671 = vmatmul.mubr.msk.f32.vlgmr.msra.gmra.mrb[2].mxu0 %vm218_vm2, %v550_v24 }
 0x4a0   :  { %2674 = vmatpush3.xpose.msk.msra.mxu1 %vm218_vm2, %v630_v17  ;;  %2675 = vmatprep.mubr.msk.f32.mxu1 %vm3024_vm1, %v3023_v36 }
 0x4a1   :  { %2683 = vmatprep.subr.mxu1 %v3023_v36  ;;  %2680 = vmatprep.mubr.msk.f32.mxu0 %vm3024_vm1, %v3023_v36 }
 0x4a3   :  { %2676 = vmatmul.mubr.msk.f32.vlgmr.msra.gmra.mrb[8].mxu1 %vm218_vm2, %v628_v25 }
 0x4a4   :  { %2685 = vmatprep.mubr.msk.f32.mxu1 %vm3024_vm1, %v3023_v36 }
 0x56e   :  { %v3211_v26 = vpop.f32.mrb[0].mxu0 }
 0x56f   :  { %v2662_v27 = vpop.f32.mrb[1].mxu0 }
 0x572   :  { %v3213_v28 = vpop.f32.mrb[6].mxu1  ;;  %v623_v29 = vpop.f32.mrb[2].mxu0 }
 0x573   :  { %v705_v30 = vsel %vm121_vm5, -1e+09, %v623_v29  ;;  %v2667_v31 = vpop.f32.mrb[7].mxu1  ;;  %v2672_v32 = vpop.f32.mrb[3].mxu0  ;;  %v1027_v29 = vld [vmem:[%s3560_s6 + $0x8] sm:$0xff] }
 0x574   :  { %v707_v34 = vsel %vm372_vm6, %v705_v30, -inf  ;;  %v1028_v31 = vld [vmem:[%s3560_s6 + $0x10] sm:$0xff]  ;;  %v1029_v32 = vld [vmem:[%s3560_s6 + $0x18] sm:$0xff] }
 0x575   :  { %708 = vmax.xlane.f32.xlu0 %v707_v34  ;;  %v2841_v34 = vpack.c.bf16 %v1029_v32, %v1028_v31 }
 0x576   :  { %v701_v37 = vpop.f32.mrb[8].mxu1 }
 0x577   :  { %v706_v38 = vsel %vm122_vm7, -1e+09, %v701_v37  ;;  %v2677_v40 = vpop.f32.mrb[9].mxu1 }
 0x578   :  { %v710_v42 = vsel %vm372_vm6, %v706_v38, -inf }
 0x579   :  { %711 = vmax.xlane.f32.xlu1 %v710_v42 }
 0x58a   :  { %808 = vrot.lane.b32.xlu1 %v3142_v39, %s3031_s19 }
 0x602   :  { %v709_v43 = vpop.xlane.xlu0 %708 }
 0x603   :  { %v713_v44 = vsub.f32 %v705_v30, %v709_v43 }
 0x605   :  { %v715_v45 = vmul.f32 1.442695, %v713_v44 }
 0x606   :  { %v712_v46 = vpop.xlane.xlu1 %711 }
 0x607   :  { %2927 = vpow2.f32 %v715_v45  ;;  %v714_v47 = vsub.f32 %v706_v38, %v712_v46  ;;  %v2483_v46 = vld [vmem:[%s3563_s9 + $0x1] ss:$0 sm:$0xff] }
 0x609   :  { %v717_v48 = vmul.f32 1.442695, %v714_v47 }
 0x60a   :  { %v809_v49 = vpop.permute.xlu1 %808 }
 0x60b   :  { %2929 = vpow2.f32 %v717_v48  ;;  %2684 = vmatpush3.msra.mxu1 %v809_v49  ;;  %v2484_v48 = vld [vmem:[%s3563_s9 + $0x2] ss:$0 sm:$0xff] }
 0x611   :  { %v2928_v50 = vpop.eup %2927 }
 0x612   :  { %v719_v51 = vsel %vm372_vm6, %v2928_v50, 0.0 }
 0x613   :  { %720 = vadd.xlane.f32.xlu0 %v719_v51 }
 0x615   :  { %v2930_v52 = vpop.eup %2929 }
 0x616   :  { %v722_v53 = vsel %vm372_vm6, %v2930_v52, 0.0 }
 0x617   :  { %723 = vadd.xlane.f32.xlu0 %v722_v53 }
 0x62d   :  { %732 = vrot.lane.b32.xlu0 %v3144_v41, %s3031_s19  ;;  %v894_v41 = vld [vmem:[%s3559_s5] sm:$0xff] }
 0x62e   :  { %v2829_v63 = vpack.c.bf16 %v895_v62, %v894_v41  ;;  %v1140_v41 = vld [vmem:[%s3562_s8 + $0x20] sm:$0xff]  ;;  %v1141_v62 = vld [vmem:[%s3562_s8 + $0x28] sm:$0xff] }
 0x6a0   :  { %v721_v39 = vpop.xlane.xlu0 %720 }
 0x6a1   :  { %2931 = vrcp.f32 %v721_v39 }
 0x6a4   :  { %v724_v54 = vpop.xlane.xlu0 %723 }
 0x6a5   :  { %2933 = vrcp.f32 %v724_v54  ;;  %v1136_v54 = vld [vmem:[%s3562_s8] sm:$0xff] }
 0x6a8   :  { %v733_v55 = vpop.permute.xlu0 %732 }
 0x6a9   :  { %2679 = vmatpush3.msra.mxu0 %v733_v55  ;;  %v1137_v55 = vld [vmem:[%s3562_s8 + $0x8] sm:$0xff] }
 0x6aa   :  { %2830 = vmatprep.subr.bf16.mxu0 %v2829_v63 }
 0x6ab   :  { %v2932_v56 = vpop.eup %2931 }
 0x6ac   :  { %v727_v58 = vmul.f32 %v2932_v56, %v2928_v50  ;;  %v2845_v56 = vpack.c.bf16 %v1137_v55, %v1136_v54 }
 0x6ae   :  { %730 = vst.msk [vmem:[#allocation4 + $0x10] sm:$0xff] %vm372_vm6, %v727_v58  ;;  %2681 = vmatmul.mubr.msk.f32.vlgmr.msra.gmra.mrb[4].mxu0 %vm372_vm6, %v727_v58  ;;  %v1138_v58 = vld [vmem:[%s3562_s8 + $0x10] sm:$0xff] }
 0x6af   :  { %v2934_v60 = vpop.eup %2933  ;;  %2832 = vmatpush3.bf16.msra.mxu0 %v2829_v63  ;;  %v2853_v63 = vpack.c.bf16 %v1141_v62, %v1140_v41  ;;  %v2491_v41 = vld [vmem:[%s3563_s9 + $0x4] ss:$0 sm:$0xff] }
 0x6b0   :  { %v728_v61 = vmul.f32 %v2934_v60, %v2930_v52  ;;  %2834 = vmatprep.subr.bf16.mxu0 %v2833_v2  ;;  %v1139_v60 = vld [vmem:[%s3562_s8 + $0x18] sm:$0xff] }
 0x6b2   :  { %731 = vst.msk [vmem:[#allocation4 + $0x18] sm:$0xff] %vm372_vm6, %v728_v61  ;;  %2686 = vmatmul.mubr.msk.f32.vlgmr.msra.gmra.mrb[10].mxu1 %vm372_vm6, %v728_v61  ;;  %v2849_v61 = vpack.c.bf16 %v1139_v60, %v1138_v58 }
 0x6b3   :  { %2836 = vmatpush3.bf16.msra.mxu0 %v2833_v2  ;;  %v2857_v2 = vpack.c.bf16 %v1143_v1, %v1142_v0  ;;  %v2492_v1 = vld [vmem:[%s3563_s9 + $0x5] ss:$0 sm:$0xff] }
 0x6b4   :  { %2846 = vmatprep.subr.bf16.mxu0 %v2845_v56 }
 0x781   :  { %v804_v3 = vpop.f32.mrb[4].mxu0 }
 0x782   :  { %886 = vrot.lane.b32.xlu1 %v804_v3, %s3032_s27  ;;  %v2682_v4 = vpop.f32.mrb[5].mxu0  ;;  %v2485_v3 = vld [vmem:[%s3561_s7] ss:$0 sm:$0xff] }
 0x785   :  { %v880_v5 = vpop.f32.mrb[10].mxu1 }
 0x786   :  { %888 = vrot.lane.b32.xlu1 %v880_v5, %s3032_s27  ;;  %v2687_v6 = vpop.f32.mrb[11].mxu1 }
 0x7f4   :  { %v887_v7 = vpop.permute.xlu1 %886 }
 0x7f5   :  { %v892_v8 = vsel %vm218_vm2, %v3211_v26, %v887_v7 }
 0x7f6   :  { %2696 = vmatprep.mubr.msk.f32.mxu0 %vm43_vm0, %v892_v8 }
 0x7f8   :  { %v889_v9 = vpop.permute.xlu1 %888 }
 0x7f9   :  { %v893_v10 = vsel %vm218_vm2, %v3213_v28, %v889_v9 }
 0x7fa   :  { %2697 = vmatmul.mubr.msk.f32.vlgmr.msra.gmra.mrb[6].mxu0 %vm43_vm0, %v893_v10 }
 0x7fb   :  { %2848 = vmatpush3.bf16.msra.mxu0 %v2845_v56 }
 0x7fc   :  { %2850 = vmatprep.subr.bf16.mxu0 %v2849_v61 }
 0x7ff   :  { %2852 = vmatpush3.bf16.msra.mxu0 %v2849_v61 }
 0x800   :  { %2854 = vmatprep.subr.bf16.mxu0 %v2853_v63 }
 0x803   :  { %2856 = vmatpush3.bf16.msra.mxu0 %v2853_v63 }
 0x804   :  { %2858 = vmatprep.subr.bf16.mxu0 %v2857_v2 }
 0x807   :  { %2860 = vmatpush3.bf16.msra.mxu0 %v2857_v2 }
 0x808   :  { %2750 = vmatprep.subr.mxu0 %v3023_v36 }
 0x8cd   :  { %v2698_v12 = vpop.f32.mrb[6].mxu0 }
 0x8ce   :  { %v981_v13 = vadd.f32 %v2698_v12, %v2480_v11  ;;  %v975_v14 = vpop.f32.mrb[7].mxu0 }
 0x8cf   :  { %v976_v15 = vadd.f32 %v2480_v11, %v975_v14 }
 0x8d0   :  { %v985_v16 = vadd.f32 %v981_v13, %v3129_v35 }
 0x8d1   :  { %v984_v17 = vadd.f32 %v976_v15, %v3125_v33  ;;  %v1026_v33 = vld [vmem:[%s3560_s6] sm:$0xff] }
 0x8d2   :  { %v991_v18 = vsel %vm43_vm0, %v985_v16, 0.0  ;;  %v2837_v30 = vpack.c.bf16 %v1027_v29, %v1026_v33 }
 0x8d3   :  { %992 = vadd.xlane.f32.xlu1 %v991_v18  ;;  %v988_v19 = vsel %vm43_vm0, %v984_v17, 0.0 }
 0x8d4   :  { %989 = vadd.xlane.f32.xlu0 %v988_v19  ;;  %2838 = vmatprep.subr.bf16.mxu1 %v2837_v30 }
 0x8d5   :  { %2840 = vmatpush3.bf16.msra.mxu1 %v2837_v30 }
 0x8d6   :  { %2842 = vmatprep.subr.bf16.mxu1 %v2841_v34 }
 0x8d9   :  { %2844 = vmatpush3.bf16.msra.mxu1 %v2841_v34 }
 0x960   :  { %v993_v20 = vpop.xlane.xlu1 %992 }
 0x961   :  { %v995_v21 = vmul.f32 0.03125, %v993_v20  ;;  %v990_v22 = vpop.xlane.xlu0 %989 }
 0x962   :  { %v994_v23 = vmul.f32 0.03125, %v990_v22 }
 0x963   :  { %v997_v24 = vsub.f32 %v985_v16, %v995_v21 }
 0x964   :  { %v996_v25 = vsub.f32 %v984_v17, %v994_v23 }
 0x965   :  { %v999_v28 = vmul.f32 %v997_v24, %v997_v24 }
 0x966   :  { %v998_v26 = vmul.f32 %v996_v25, %v996_v25 }
 0x967   :  { %v1003_v35 = vsel %vm43_vm0, %v999_v28, 0.0 }
 0x968   :  { %v1000_v27 = vsel %vm43_vm0, %v998_v26, 0.0  ;;  %v2488_v26 = vld [vmem:[%s3563_s9 + $0x3] ss:$0 sm:$0xff] }
 0x969   :  { %1001 = vadd.xlane.f32.xlu0 %v1000_v27 }
 0x96d   :  { %1004 = vadd.xlane.f32.xlu0 %v1003_v35 }
 0x9f6   :  { %v1002_v37 = vpop.xlane.xlu0 %1001 }
 0x9f7   :  { %v1006_v38 = vmul.f32 0.03125, %v1002_v37 }
 0x9f9   :  { %v1008_v40 = vadd.f32 1e-06, %v1006_v38 }
 0x9fa   :  { %v1005_v42 = vpop.xlane.xlu0 %1004 }
 0x9fb   :  { %2935 = vrsqrt.f32 %v1008_v40  ;;  %v1007_v43 = vmul.f32 0.03125, %v1005_v42 }
 0x9fd   :  { %v1009_v44 = vadd.f32 1e-06, %v1007_v43 }
 0x9ff   :  { %2937 = vrsqrt.f32 %v1009_v44 }
 0xa05   :  { %v2936_v45 = vpop.eup %2935 }
 0xa06   :  { %v1012_v47 = vmul.f32 %v2936_v45, %v996_v25 }
 0xa08   :  { %v1018_v49 = vmul.f32 %v2483_v46, %v1012_v47 }
 0xa09   :  { %v2938_v50 = vpop.eup %2937 }
 0xa0a   :  { %v1013_v51 = vmul.f32 %v2938_v50, %v997_v24  ;;  %v1024_v52 = vadd.f32 %v2484_v48, %v1018_v49  ;;  %v2494_v49 = vld [vmem:[%s3557_s3 + $0x28] sm:$0xff] }
 0xa0c   :  { %v1019_v53 = vmul.f32 %v2483_v46, %v1013_v51  ;;  %2707 = vmatprep.mubr.msk.f32.mxu1 %vm43_vm0, %v1024_v52  ;;  %v2495_v51 = vld [vmem:[%s3557_s3 + $0x30] sm:$0xff] }
 0xa0e   :  { %v1025_v39 = vadd.f32 %v2484_v48, %v1019_v53  ;;  %v2493_v48 = vld [vmem:[%s3557_s3 + $0x20] sm:$0xff] }
 0xa0f   :  { %v2861_v50 = vpack.c.bf16 %v2494_v49, %v2493_v48 }
 0xa10   :  { %2708 = vmatmul.mubr.msk.f32.vlgmr.msra.gmra.mrb[12].mxu1 %vm43_vm0, %v1025_v39 }
 0xa11   :  { %2862 = vmatprep.subr.bf16.mxu1 %v2861_v50 }
 0xa12   :  { %2864 = vmatpush3.bf16.msra.mxu1 %v2861_v50 }
 0xae3   :  { %v2709_v4 = vpop.f32.mrb[12].mxu1 }
 0xae4   :  { %v1115_v5 = vadd.f32 %v2709_v4, %v2485_v3  ;;  %v1109_v6 = vpop.f32.mrb[13].mxu1 }
 0xae5   :  { %v1110_v7 = vadd.f32 %v2485_v3, %v1109_v6  ;;  %v2498_v6 = vld [vmem:[%s3558_s4 + $0x1] ss:$0 sm:$0xff] }
 0xae6   :  { %v1119_v8 = vmul.f32 %v1115_v5, %v1115_v5 }
 0xae7   :  { %v1118_v9 = vmul.f32 %v1110_v7, %v1110_v7 }
 0xae8   :  { %v1121_v10 = vmul.f32 %v1119_v8, %v1115_v5 }
 0xae9   :  { %v1120_v11 = vmul.f32 %v1118_v9, %v1110_v7 }
 0xaea   :  { %v1123_v12 = vmul.f32 0.044715, %v1121_v10 }
 0xaeb   :  { %v1122_v13 = vmul.f32 0.044715, %v1120_v11 }
 0xaec   :  { %v1125_v14 = vadd.f32 %v1123_v12, %v1115_v5 }
 0xaed   :  { %v1124_v15 = vadd.f32 %v1122_v13, %v1110_v7 }
 0xaee   :  { %v1127_v16 = vmul.f32 0.7978846, %v1125_v14 }
 0xaef   :  { %v1126_v17 = vmul.f32 0.7978846, %v1124_v15 }
 0xaf0   :  { %2939 = vtanh.f32 %v1127_v16 }
 0xaf1   :  { %2941 = vtanh.f32 %v1126_v17 }
 0xafa   :  { %v2940_v18 = vpop.eup %2939 }
 0xafb   :  { %v2942_v19 = vpop.eup %2941  ;;  %v1131_v20 = vadd.f32 1.0, %v2940_v18 }
 0xafc   :  { %v1130_v21 = vadd.f32 1.0, %v2942_v19 }
 0xafd   :  { %v1133_v22 = vmul.f32 0.5, %v1131_v20 }
 0xafe   :  { %v1132_v23 = vmul.f32 0.5, %v1130_v21 }
 0xaff   :  { %v1135_v25 = vmul.f32 %v1133_v22, %v1115_v5 }
 0xb00   :  { %v1134_v24 = vmul.f32 %v1132_v23, %v1110_v7 }
 0xb02   :  { %2726 = vmatprep.mubr.msk.f32.mxu0 %vm1149_vm8, %v1134_v24 }
 0xb03   :  { %2727 = vmatmul.mubr.msk.f32.vlgmr.msra.gmra.mrb[8].mxu0 %vm1149_vm8, %v1135_v25 }
 0xb04   :  { %2752 = vmatprep.mubr.msk.f32.mxu0 %vm3024_vm1, %v3023_v36 }
 0xbd6   :  { %v2728_v27 = vpop.f32.mrb[8].mxu0 }
 0xbd7   :  { %v1228_v28 = vadd.f32 %v2728_v27, %v2488_v26  ;;  %v1222_v35 = vpop.f32.mrb[9].mxu0 }
 0xbd8   :  { %v1223_v33 = vadd.f32 %v2488_v26, %v1222_v35 }
 0xbd9   :  { %v1232_v29 = vadd.f32 %v1228_v28, %v1025_v39 }
 0xbda   :  { %v1231_v30 = vadd.f32 %v1223_v33, %v1024_v52  ;;  %v2496_v52 = vld [vmem:[%s3557_s3 + $0x38] sm:$0xff] }
 0xbdb   :  { %v1238_v31 = vsel %vm43_vm0, %v1232_v29, 0.0  ;;  %v2865_v53 = vpack.c.bf16 %v2496_v52, %v2495_v51 }
 0xbdc   :  { %1239 = vadd.xlane.f32.xlu1 %v1238_v31  ;;  %v1235_v32 = vsel %vm43_vm0, %v1231_v30, 0.0 }
 0xbdd   :  { %1236 = vadd.xlane.f32.xlu0 %v1235_v32  ;;  %2866 = vmatprep.subr.bf16.mxu1 %v2865_v53 }
 0xbde   :  { %2868 = vmatpush3.bf16.msra.mxu1 %v2865_v53 }
 0xbdf   :  { %2740 = vmatprep.subr.mxu1 %v3023_v36 }
 0xc69   :  { %v1240_v34 = vpop.xlane.xlu1 %1239 }
 0xc6a   :  { %v1242_v37 = vmul.f32 0.03125, %v1240_v34  ;;  %v1237_v38 = vpop.xlane.xlu0 %1236 }
 0xc6b   :  { %v1241_v40 = vmul.f32 0.03125, %v1237_v38 }
 0xc6c   :  { %v1244_v42 = vsub.f32 %v1232_v29, %v1242_v37 }
 0xc6d   :  { %v1243_v43 = vsub.f32 %v1231_v30, %v1241_v40 }
 0xc6e   :  { %v1246_v44 = vmul.f32 %v1244_v42, %v1244_v42 }
 0xc6f   :  { %v1245_v45 = vmul.f32 %v1243_v43, %v1243_v43 }
 0xc70   :  { %v1250_v46 = vsel %vm43_vm0, %v1246_v44, 0.0 }
 0xc71   :  { %1251 = vadd.xlane.f32.xlu1 %v1250_v46  ;;  %v1247_v47 = vsel %vm43_vm0, %v1245_v45, 0.0 }
 0xc72   :  { %1248 = vadd.xlane.f32.xlu0 %v1247_v47 }
 0xcfe   :  { %v1252_v39 = vpop.xlane.xlu1 %1251 }
 0xcff   :  { %v1254_v54 = vmul.f32 0.03125, %v1252_v39  ;;  %v1249_v55 = vpop.xlane.xlu0 %1248 }
 0xd00   :  { %v1253_v56 = vmul.f32 0.03125, %v1249_v55 }
 0xd01   :  { %v1256_v58 = vadd.f32 1e-06, %v1254_v54 }
 0xd02   :  { %v1255_v60 = vadd.f32 1e-06, %v1253_v56 }
 0xd03   :  { %2943 = vrsqrt.f32 %v1256_v58 }
 0xd04   :  { %2945 = vrsqrt.f32 %v1255_v60 }
 0xd0d   :  { %v2944_v61 = vpop.eup %2943 }
 0xd0e   :  { %v2946_v62 = vpop.eup %2945  ;;  %v1260_v63 = vmul.f32 %v2944_v61, %v1244_v42 }
 0xd0f   :  { %v1259_v0 = vmul.f32 %v2946_v62, %v1243_v43 }
 0xd10   :  { %v1266_v2 = vmul.f32 %v2491_v41, %v1260_v63 }
 0xd11   :  { %v1265_v3 = vmul.f32 %v2491_v41, %v1259_v0 }
 0xd12   :  { %v3340_v5 = vadd.f32 %v2492_v1, %v1266_v2 }
 0xd13   :  { %v3338_v4 = vadd.f32 %v2492_v1, %v1265_v3 }
 0xd15   :  { %2737 = vmatprep.mubr.msk.f32.mxu1 %vm43_vm0, %v3338_v4 }
 0xd16   :  { %2738 = vmatmul.mubr.msk.f32.vlgmr.msra.gmra.mrb[14].mxu1 %vm43_vm0, %v3340_v5 }
 0xd17   :  { %2742 = vmatprep.mubr.msk.f32.mxu1 %vm3024_vm1, %v3023_v36 }
 0xde9   :  { %v2739_v7 = vpop.f32.mrb[14].mxu1 }
 0xdea   :  { %v3351_v8 = vadd.f32 %v2739_v7, %v2498_v6  ;;  %v1358_v9 = vpop.f32.mrb[15].mxu1 }
 0xdeb   :  { %v3353_v10 = vadd.f32 %v2498_v6, %v1358_v9 }
 0xdec   :  { %1445 = vrot.lane.b32.xlu1 %v3351_v8, %s3025_s14 }
 0xded   :  { %1368 = vrot.lane.b32.xlu0 %v3353_v10, %s3025_s14 }
 0xe5e   :  { %v1446_v12 = vpop.permute.xlu1 %1445 }
 0xe5f   :  { %v1369_v11 = vpop.permute.xlu0 %1368 }
 0xe60   :  { %2741 = vmatpush3.xpose.msk.msra.mxu1 %vm218_vm2, %v1369_v11 }
 0xe61   :  { %2745 = vmatprep.subr.mxu1 %v3023_v36 }
 0xe63   :  { %2743 = vmatmul.mubr.msk.f32.vlgmr.msra.gmra.mrb[16].mxu1 %vm218_vm2, %v3353_v10 }
 0xe64   :  { %2746 = vmatpush3.xpose.msk.msra.mxu1 %vm218_vm2, %v1446_v12  ;;  %2747 = vmatprep.mubr.msk.f32.mxu1 %vm3024_vm1, %v3023_v36  ;;  %v2514_v12 = vld [vmem:[%s3559_s5 + $0x28] sm:$0xff] }
 0xe65   :  { %2755 = vmatprep.subr.mxu1 %v3023_v36 }
 0xe67   :  { %2748 = vmatmul.mubr.msk.f32.vlgmr.msra.gmra.mrb[18].mxu1 %vm218_vm2, %v3351_v8 }
 0xe68   :  { %2757 = vmatprep.mubr.msk.f32.mxu1 %vm3024_vm1, %v3023_v36 }
 0xf36   :  { %v1440_v13 = vpop.f32.mrb[16].mxu1 }
 0xf37   :  { %v1521_v14 = vsel %vm121_vm5, -1e+09, %v1440_v13  ;;  %v2744_v15 = vpop.f32.mrb[17].mxu1 }
 0xf38   :  { %v1523_v16 = vsel %vm372_vm6, %v1521_v14, -inf  ;;  %v2516_v15 = vld [vmem:[%s3559_s5 + $0x38] sm:$0xff] }
 0xf39   :  { %1524 = vmax.xlane.f32.xlu1 %v1523_v16 }
 0xf3a   :  { %v1517_v17 = vpop.f32.mrb[18].mxu1 }
 0xf3b   :  { %v1522_v18 = vsel %vm122_vm7, -1e+09, %v1517_v17  ;;  %v2749_v19 = vpop.f32.mrb[19].mxu1 }
 0xf3c   :  { %v1526_v20 = vsel %vm372_vm6, %v1522_v18, -inf }
 0xf3d   :  { %1527 = vmax.xlane.f32.xlu0 %v1526_v20 }
 0xf4a   :  { %1624 = vrot.lane.b32.xlu1 %v3351_v8, %s3028_s1 }
 0xf4e   :  { %1702 = vrot.lane.b32.xlu1 %v3353_v10, %s3029_s17 }
 0xf52   :  { %1780 = vrot.lane.b32.xlu1 %v3351_v8, %s3029_s17 }
 0xf53   :  { %1548 = vrot.lane.b32.xlu0 %v3353_v10, %s3028_s1 }
 0xfc6   :  { %v1525_v21 = vpop.xlane.xlu1 %1524 }
 0xfc7   :  { %v1529_v22 = vsub.f32 %v1521_v14, %v1525_v21  ;;  %v2515_v14 = vld [vmem:[%s3559_s5 + $0x30] sm:$0xff] }
 0xfc8   :  { %v2873_v16 = vpack.c.bf16 %v2516_v15, %v2515_v14  ;;  %v2530_v14 = vld [vmem:[%s3561_s7 + $0x1] ss:$0 sm:$0xff] }
 0xfc9   :  { %v1531_v23 = vmul.f32 1.442695, %v1529_v22 }
 0xfca   :  { %v1625_v24 = vpop.permute.xlu1 %1624  ;;  %v1528_v25 = vpop.xlane.xlu0 %1527 }
 0xfcb   :  { %2947 = vpow2.f32 %v1531_v23  ;;  %v1530_v26 = vsub.f32 %v1522_v18, %v1528_v25  ;;  %2756 = vmatpush3.msra.mxu1 %v1625_v24  ;;  %v2518_v25 = vld [vmem:[%s3563_s9 + $0x8] ss:$0 sm:$0xff] }
 0xfcc   :  { %2765 = vmatprep.subr.mxu1 %v3023_v36 }
 0xfcd   :  { %v1533_v27 = vmul.f32 1.442695, %v1530_v26 }
 0xfce   :  { %v1549_v28 = vpop.permute.xlu0 %1548  ;;  %v1703_v31 = vpop.permute.xlu1 %1702 }
 0xfcf   :  { %2949 = vpow2.f32 %v1533_v27  ;;  %2751 = vmatpush3.msra.mxu0 %v1549_v28 }
 0xfd0   :  { %2760 = vmatprep.subr.mxu0 %v3023_v36 }
 0xfd2   :  { %v1781_v32 = vpop.permute.xlu1 %1780 }
 0xfd5   :  { %v2948_v35 = vpop.eup %2947 }
 0xfd6   :  { %v1535_v33 = vsel %vm372_vm6, %v2948_v35, 0.0 }
 0xfd7   :  { %1536 = vadd.xlane.f32.xlu0 %v1535_v33 }
 0xfd9   :  { %v2950_v29 = vpop.eup %2949 }
 0xfda   :  { %v1538_v30 = vsel %vm372_vm6, %v2950_v29, 0.0 }
 0xfdb   :  { %1539 = vadd.xlane.f32.xlu1 %v1538_v30 }
 0xfec   :  { %1778 = vrot.lane.b32.xlu1 %v3351_v8, %s3030_s18 }
 0xfed   :  { %1700 = vrot.lane.b32.xlu0 %v3353_v10, %s3030_s18 }
0x1064   :  { %v1537_v34 = vpop.xlane.xlu0 %1536 }
0x1065   :  { %2951 = vrcp.f32 %v1537_v34 }
0x1068   :  { %v1540_v37 = vpop.xlane.xlu1 %1539  ;;  %v1701_v44 = vpop.permute.xlu0 %1700 }
0x1069   :  { %2953 = vrcp.f32 %v1540_v37 }
0x106c   :  { %v1779_v45 = vpop.permute.xlu1 %1778 }
0x106f   :  { %v2952_v38 = vpop.eup %2951 }
0x1070   :  { %v1543_v40 = vmul.f32 %v2952_v38, %v2948_v35 }
0x1072   :  { %1546 = vst.msk [vmem:[#allocation4 + $0x20] sm:$0xff] %vm372_vm6, %v1543_v40  ;;  %2753 = vmatmul.mubr.msk.f32.vlgmr.msra.gmra.mrb[10].mxu0 %vm372_vm6, %v1543_v40 }
0x1073   :  { %v2954_v42 = vpop.eup %2953  ;;  %2761 = vmatpush3.xpose.msk.msra.mxu0 %vm218_vm2, %v1703_v31  ;;  %2762 = vmatprep.mubr.msk.f32.mxu0 %vm3024_vm1, %v3023_v36 }
0x1074   :  { %v1544_v43 = vmul.f32 %v2954_v42, %v2950_v29  ;;  %2770 = vmatprep.subr.mxu0 %v3023_v36 }
0x1076   :  { %1547 = vst.msk [vmem:[#allocation4 + $0x28] sm:$0xff] %vm372_vm6, %v1544_v43  ;;  %2758 = vmatmul.mubr.msk.f32.vlgmr.msra.gmra.mrb[20].mxu1 %vm372_vm6, %v1544_v43  ;;  %2763 = vmatmul.mubr.msk.f32.vlgmr.msra.gmra.mrb[12].mxu0 %vm218_vm2, %v1701_v44 }
0x1077   :  { %2766 = vmatpush3.xpose.msk.msra.mxu1 %vm218_vm2, %v1781_v32  ;;  %2767 = vmatprep.mubr.msk.f32.mxu1 %vm3024_vm1, %v3023_v36 }
0x1078   :  { %2775 = vmatprep.subr.mxu1 %v3023_v36  ;;  %2772 = vmatprep.mubr.msk.f32.mxu0 %vm3024_vm1, %v3023_v36 }
0x107a   :  { %2768 = vmatmul.mubr.msk.f32.vlgmr.msra.gmra.mrb[22].mxu1 %vm218_vm2, %v1779_v45 }
0x107b   :  { %2777 = vmatprep.mubr.msk.f32.mxu1 %vm3024_vm1, %v3023_v36 }
0x1145   :  { %v3411_v46 = vpop.f32.mrb[10].mxu0 }
0x1146   :  { %v2754_v47 = vpop.f32.mrb[11].mxu0 }
0x1149   :  { %v3413_v48 = vpop.f32.mrb[20].mxu1  ;;  %v1774_v49 = vpop.f32.mrb[12].mxu0 }
0x114a   :  { %v1856_v50 = vsel %vm121_vm5, -1e+09, %v1774_v49  ;;  %v2759_v51 = vpop.f32.mrb[21].mxu1  ;;  %v2764_v52 = vpop.f32.mrb[13].mxu0  ;;  %v2528_v49 = vld [vmem:[%s3560_s6 + $0x38] sm:$0xff] }
0x114b   :  { %v1858_v53 = vsel %vm372_vm6, %v1856_v50, -inf }
0x114c   :  { %1859 = vmax.xlane.f32.xlu0 %v1858_v53 }
0x114d   :  { %v1852_v39 = vpop.f32.mrb[22].mxu1 }
0x114e   :  { %v1857_v54 = vsel %vm122_vm7, -1e+09, %v1852_v39  ;;  %v2769_v55 = vpop.f32.mrb[23].mxu1 }
0x114f   :  { %v1861_v36 = vsel %vm372_vm6, %v1857_v54, -inf }
0x1150   :  { %1862 = vmax.xlane.f32.xlu1 %v1861_v36 }
0x1161   :  { %1959 = vrot.lane.b32.xlu1 %v3351_v8, %s3031_s19 }
0x11d9   :  { %v1860_v56 = vpop.xlane.xlu0 %1859 }
0x11da   :  { %v1864_v58 = vsub.f32 %v1856_v50, %v1860_v56  ;;  %v2523_v56 = vld [vmem:[%s3563_s9 + $0x9] ss:$0 sm:$0xff] }
0x11dc   :  { %v1866_v57 = vmul.f32 1.442695, %v1864_v58 }
0x11dd   :  { %v1863_v60 = vpop.xlane.xlu1 %1862 }
0x11de   :  { %2955 = vpow2.f32 %v1866_v57  ;;  %v1865_v61 = vsub.f32 %v1857_v54, %v1863_v60  ;;  %v2524_v57 = vld [vmem:[%s3563_s9 + $0xa] ss:$0 sm:$0xff] }
0x11e0   :  { %v1868_v41 = vmul.f32 1.442695, %v1865_v61 }
0x11e1   :  { %v1960_v62 = vpop.permute.xlu1 %1959 }
0x11e2   :  { %2957 = vpow2.f32 %v1868_v41  ;;  %2776 = vmatpush3.msra.mxu1 %v1960_v62 }
0x11e8   :  { %v2956_v63 = vpop.eup %2955 }
0x11e9   :  { %v1870_v59 = vsel %vm372_vm6, %v2956_v63, 0.0 }
0x11ea   :  { %1871 = vadd.xlane.f32.xlu0 %v1870_v59 }
0x11ec   :  { %v2958_v0 = vpop.eup %2957 }
0x11ed   :  { %v1873_v1 = vsel %vm372_vm6, %v2958_v0, 0.0 }
0x11ee   :  { %1874 = vadd.xlane.f32.xlu0 %v1873_v1  ;;  %v2534_v1 = vld [vmem:[%s3562_s8 + $0x48] sm:$0xff] }
0x1204   :  { %1883 = vrot.lane.b32.xlu0 %v3353_v10, %s3031_s19  ;;  %v2513_v10 = vld [vmem:[%s3559_s5 + $0x20] sm:$0xff] }
0x1205   :  { %v2869_v13 = vpack.c.bf16 %v2514_v12, %v2513_v10  ;;  %v2539_v10 = vld [vmem:[%s3562_s8 + $0x70] sm:$0xff]  ;;  %v2540_v12 = vld [vmem:[%s3562_s8 + $0x78] sm:$0xff] }
0x1277   :  { %v1872_v2 = vpop.xlane.xlu0 %1871 }
0x1278   :  { %2959 = vrcp.f32 %v1872_v2 }
0x127b   :  { %v1875_v3 = vpop.xlane.xlu0 %1874 }
0x127c   :  { %2961 = vrcp.f32 %v1875_v3  ;;  %v2535_v3 = vld [vmem:[%s3562_s8 + $0x50] sm:$0xff] }
0x127f   :  { %v1884_v6 = vpop.permute.xlu0 %1883 }
0x1280   :  { %2771 = vmatpush3.msra.mxu0 %v1884_v6  ;;  %v2536_v6 = vld [vmem:[%s3562_s8 + $0x58] sm:$0xff] }
0x1281   :  { %2870 = vmatprep.subr.bf16.mxu0 %v2869_v13 }
0x1282   :  { %v2960_v7 = vpop.eup %2959 }
0x1283   :  { %v1878_v8 = vmul.f32 %v2960_v7, %v2956_v63  ;;  %v2889_v7 = vpack.c.bf16 %v2536_v6, %v2535_v3 }
0x1285   :  { %1881 = vst.msk [vmem:[#allocation4 + $0x30] sm:$0xff] %vm372_vm6, %v1878_v8  ;;  %2773 = vmatmul.mubr.msk.f32.vlgmr.msra.gmra.mrb[14].mxu0 %vm372_vm6, %v1878_v8  ;;  %v2537_v8 = vld [vmem:[%s3562_s8 + $0x60] sm:$0xff] }
0x1286   :  { %v2962_v9 = vpop.eup %2961  ;;  %2872 = vmatpush3.bf16.msra.mxu0 %v2869_v13  ;;  %v2897_v13 = vpack.c.bf16 %v2540_v12, %v2539_v10 }
0x1287   :  { %v1879_v11 = vmul.f32 %v2962_v9, %v2958_v0  ;;  %2874 = vmatprep.subr.bf16.mxu0 %v2873_v16  ;;  %v2533_v0 = vld [vmem:[%s3562_s8 + $0x40] sm:$0xff]  ;;  %v2538_v9 = vld [vmem:[%s3562_s8 + $0x68] sm:$0xff] }
0x1288   :  { %v2885_v2 = vpack.c.bf16 %v2534_v1, %v2533_v0 }
0x1289   :  { %1882 = vst.msk [vmem:[#allocation4 + $0x38] sm:$0xff] %vm372_vm6, %v1879_v11  ;;  %2778 = vmatmul.mubr.msk.f32.vlgmr.msra.gmra.mrb[24].mxu1 %vm372_vm6, %v1879_v11  ;;  %v2893_v11 = vpack.c.bf16 %v2538_v9, %v2537_v8 }
0x128a   :  { %2876 = vmatpush3.bf16.msra.mxu0 %v2873_v16 }
0x128b   :  { %2886 = vmatprep.subr.bf16.mxu0 %v2885_v2 }
0x1358   :  { %v1955_v17 = vpop.f32.mrb[14].mxu0 }
0x1359   :  { %2037 = vrot.lane.b32.xlu1 %v1955_v17, %s3032_s27  ;;  %v2774_v18 = vpop.f32.mrb[15].mxu0 }
0x135c   :  { %v2031_v19 = vpop.f32.mrb[24].mxu1 }
0x135d   :  { %2039 = vrot.lane.b32.xlu1 %v2031_v19, %s3032_s27  ;;  %v2779_v20 = vpop.f32.mrb[25].mxu1 }
0x13cb   :  { %v2038_v21 = vpop.permute.xlu1 %2037 }
0x13cc   :  { %v2043_v22 = vsel %vm218_vm2, %v3411_v46, %v2038_v21  ;;  %v2526_v46 = vld [vmem:[%s3560_s6 + $0x28] sm:$0xff] }
0x13cd   :  { %2788 = vmatprep.mubr.msk.f32.mxu0 %vm43_vm0, %v2043_v22 }
0x13cf   :  { %v2040_v23 = vpop.permute.xlu1 %2039 }
0x13d0   :  { %v2044_v24 = vsel %vm218_vm2, %v3413_v48, %v2040_v23  ;;  %v2527_v48 = vld [vmem:[%s3560_s6 + $0x30] sm:$0xff] }
0x13d1   :  { %2789 = vmatmul.mubr.msk.f32.vlgmr.msra.gmra.mrb[16].mxu0 %vm43_vm0, %v2044_v24  ;;  %v2881_v50 = vpack.c.bf16 %v2528_v49, %v2527_v48 }
0x13d2   :  { %2888 = vmatpush3.bf16.msra.mxu0 %v2885_v2 }
0x13d3   :  { %2890 = vmatprep.subr.bf16.mxu0 %v2889_v7 }
0x13d6   :  { %2892 = vmatpush3.bf16.msra.mxu0 %v2889_v7 }
0x13d7   :  { %2894 = vmatprep.subr.bf16.mxu0 %v2893_v11 }
0x13da   :  { %2896 = vmatpush3.bf16.msra.mxu0 %v2893_v11 }
0x13db   :  { %2898 = vmatprep.subr.bf16.mxu0 %v2897_v13 }
0x13de   :  { %2900 = vmatpush3.bf16.msra.mxu0 %v2897_v13 }
0x14a4   :  { %v2790_v26 = vpop.f32.mrb[16].mxu0 }
0x14a5   :  { %v2134_v27 = vadd.f32 %v2790_v26, %v2518_v25  ;;  %v2128_v28 = vpop.f32.mrb[17].mxu0 }
0x14a6   :  { %v2129_v35 = vadd.f32 %v2518_v25, %v2128_v28 }
0x14a7   :  { %v2138_v33 = vadd.f32 %v2134_v27, %v3340_v5 }
0x14a8   :  { %v2137_v29 = vadd.f32 %v2129_v35, %v3338_v4  ;;  %v2525_v4 = vld [vmem:[%s3560_s6 + $0x20] sm:$0xff] }
0x14a9   :  { %v2144_v30 = vsel %vm43_vm0, %v2138_v33, 0.0  ;;  %v2877_v47 = vpack.c.bf16 %v2526_v46, %v2525_v4 }
0x14aa   :  { %2145 = vadd.xlane.f32.xlu1 %v2144_v30  ;;  %v2141_v31 = vsel %vm43_vm0, %v2137_v29, 0.0 }
0x14ab   :  { %2142 = vadd.xlane.f32.xlu0 %v2141_v31  ;;  %2878 = vmatprep.subr.bf16.mxu1 %v2877_v47 }
0x14ac   :  { %2880 = vmatpush3.bf16.msra.mxu1 %v2877_v47 }
0x14ad   :  { %2882 = vmatprep.subr.bf16.mxu1 %v2881_v50 }
0x14b0   :  { %2884 = vmatpush3.bf16.msra.mxu1 %v2881_v50 }
0x1537   :  { %v2146_v32 = vpop.xlane.xlu1 %2145 }
0x1538   :  { %v2148_v34 = vmul.f32 0.03125, %v2146_v32  ;;  %v2143_v37 = vpop.xlane.xlu0 %2142 }
0x1539   :  { %v2147_v38 = vmul.f32 0.03125, %v2143_v37 }
0x153a   :  { %v2150_v40 = vsub.f32 %v2138_v33, %v2148_v34 }
0x153b   :  { %v2149_v42 = vsub.f32 %v2137_v29, %v2147_v38  ;;  %v2542_v38 = vld [vmem:[%s3563_s9 + $0xb] ss:$0 sm:$0xff] }
0x153c   :  { %v2152_v45 = vmul.f32 %v2150_v40, %v2150_v40 }
0x153d   :  { %v2151_v43 = vmul.f32 %v2149_v42, %v2149_v42 }
0x153e   :  { %v2156_v5 = vsel %vm43_vm0, %v2152_v45, 0.0 }
0x153f   :  { %v2153_v44 = vsel %vm43_vm0, %v2151_v43, 0.0 }
0x1540   :  { %2154 = vadd.xlane.f32.xlu0 %v2153_v44 }
0x1544   :  { %2157 = vadd.xlane.f32.xlu0 %v2156_v5 }
0x15cd   :  { %v2155_v51 = vpop.xlane.xlu0 %2154 }
0x15ce   :  { %v2159_v52 = vmul.f32 0.03125, %v2155_v51 }
0x15d0   :  { %v2161_v53 = vadd.f32 1e-06, %v2159_v52 }
0x15d1   :  { %v2158_v39 = vpop.xlane.xlu0 %2157 }
0x15d2   :  { %2963 = vrsqrt.f32 %v2161_v53  ;;  %v2160_v54 = vmul.f32 0.03125, %v2158_v39 }
0x15d4   :  { %v2162_v55 = vadd.f32 1e-06, %v2160_v54 }
0x15d6   :  { %2965 = vrsqrt.f32 %v2162_v55 }
0x15dc   :  { %v2964_v36 = vpop.eup %2963 }
0x15dd   :  { %v2165_v58 = vmul.f32 %v2964_v36, %v2149_v42 }
0x15df   :  { %v2171_v60 = vmul.f32 %v2523_v56, %v2165_v58 }
0x15e0   :  { %v2966_v61 = vpop.eup %2965 }
0x15e1   :  { %v2166_v41 = vmul.f32 %v2966_v61, %v2150_v40  ;;  %v2177_v62 = vadd.f32 %v2524_v57, %v2171_v60 }
0x15e3   :  { %v2172_v63 = vmul.f32 %v2523_v56, %v2166_v41  ;;  %2799 = vmatprep.mubr.msk.f32.mxu1 %vm43_vm0, %v2177_v62 }
0x15e5   :  { %v2178_v59 = vadd.f32 %v2524_v57, %v2172_v63 }
0x15e7   :  { %2800 = vmatmul.mubr.msk.f32.vlgmr.msra.gmra.mrb[26].mxu1 %vm43_vm0, %v2178_v59 }
0x16ba   :  { %v2801_v15 = vpop.f32.mrb[26].mxu1 }
0x16bb   :  { %v2270_v16 = vadd.f32 %v2801_v15, %v2530_v14  ;;  %v2264_v17 = vpop.f32.mrb[27].mxu1 }
0x16bc   :  { %v2265_v18 = vadd.f32 %v2530_v14, %v2264_v17 }
0x16bd   :  { %v2274_v19 = vmul.f32 %v2270_v16, %v2270_v16 }
0x16be   :  { %v2273_v20 = vmul.f32 %v2265_v18, %v2265_v18 }
0x16bf   :  { %v2276_v21 = vmul.f32 %v2274_v19, %v2270_v16 }
0x16c0   :  { %v2275_v22 = vmul.f32 %v2273_v20, %v2265_v18 }
0x16c1   :  { %v2278_v23 = vmul.f32 0.044715, %v2276_v21 }
0x16c2   :  { %v2277_v24 = vmul.f32 0.044715, %v2275_v22 }
0x16c3   :  { %v2280_v25 = vadd.f32 %v2278_v23, %v2270_v16 }
0x16c4   :  { %v2279_v26 = vadd.f32 %v2277_v24, %v2265_v18 }
0x16c5   :  { %v2282_v27 = vmul.f32 0.7978846, %v2280_v25 }
0x16c6   :  { %v2281_v28 = vmul.f32 0.7978846, %v2279_v26 }
0x16c7   :  { %2967 = vtanh.f32 %v2282_v27 }
0x16c8   :  { %2969 = vtanh.f32 %v2281_v28 }
0x16d1   :  { %v2968_v35 = vpop.eup %2967 }
0x16d2   :  { %v2970_v33 = vpop.eup %2969  ;;  %v2286_v29 = vadd.f32 1.0, %v2968_v35 }
0x16d3   :  { %v2285_v30 = vadd.f32 1.0, %v2970_v33 }
0x16d4   :  { %v2288_v31 = vmul.f32 0.5, %v2286_v29 }
0x16d5   :  { %v2287_v32 = vmul.f32 0.5, %v2285_v30 }
0x16d6   :  { %v2290_v37 = vmul.f32 %v2288_v31, %v2270_v16 }
0x16d7   :  { %v2289_v34 = vmul.f32 %v2287_v32, %v2265_v18 }
0x16d9   :  { %2818 = vmatprep.mubr.msk.f32.mxu0 %vm1149_vm8, %v2289_v34 }
0x16da   :  { %2819 = vmatmul.mubr.msk.f32.vlgmr.msra.gmra.mrb[18].mxu0 %vm1149_vm8, %v2290_v37 }
0x17ad   :  { %v2820_v40 = vpop.f32.mrb[18].mxu0 }
0x17ae   :  { %v2383_v42 = vadd.f32 %v2820_v40, %v2542_v38  ;;  %v2377_v43 = vpop.f32.mrb[19].mxu0 }
0x17af   :  { %v2378_v44 = vadd.f32 %v2542_v38, %v2377_v43 }
0x17b0   :  { %v2387_v45 = vadd.f32 %v2383_v42, %v2178_v59 }
0x17b1   :  { %v2386_v5 = vadd.f32 %v2378_v44, %v2177_v62 }
0x17b2   :  { %v2393_v4 = vsel %vm43_vm0, %v2387_v45, 0.0 }
0x17b3   :  { %2394 = vadd.xlane.f32.xlu1 %v2393_v4  ;;  %v2390_v46 = vsel %vm43_vm0, %v2386_v5, 0.0 }
0x17b4   :  { %2391 = vadd.xlane.f32.xlu0 %v2390_v46 }
0x1840   :  { %v2395_v47 = vpop.xlane.xlu1 %2394 }
0x1841   :  { %v2397_v48 = vmul.f32 0.03125, %v2395_v47  ;;  %v2392_v49 = vpop.xlane.xlu0 %2391 }
0x1842   :  { %v2396_v50 = vmul.f32 0.03125, %v2392_v49 }
0x1843   :  { %v2399_v51 = vsub.f32 %v2387_v45, %v2397_v48 }
0x1844   :  { %v2398_v52 = vsub.f32 %v2386_v5, %v2396_v50 }
0x1845   :  { %v2401_v53 = vmul.f32 %v2399_v51, %v2399_v51 }
0x1846   :  { %v2400_v39 = vmul.f32 %v2398_v52, %v2398_v52 }
0x1847   :  { %v2405_v54 = vsel %vm43_vm0, %v2401_v53, 0.0 }
0x1848   :  { %2406 = vadd.xlane.f32.xlu1 %v2405_v54  ;;  %v2402_v55 = vsel %vm43_vm0, %v2400_v39, 0.0 }
0x1849   :  { %2403 = vadd.xlane.f32.xlu0 %v2402_v55 }
0x184a   :  { %2986 = shalt.err (!%p2983_p4)
}
0x184b   :  { %s2987_s21 = scalar_lea.hbm %s3565_s11, 1024 }
0x184c   :  { %p2988_p5 = scmp.ne.s32.totalorder %s3565_s11, %s2987_s21  ;;  %p2991_p6 = scmp.lt.u32.totalorder %s2987_s21, %s3565_s11 }
0x184e   :  { %p2993_p7 = pnand %p2991_p6, %p2988_p5 }
0x1850   :  { %2996 = shalt.err (!%p2993_p7)
}
0x1851   :  { %s3034_s24 = smov 128   ;;  %s3035_s25 = smov 8   ;;  %v2547_v62 = vld [vmem:[%s3563_s9 + $0xc] ss:$0 sm:$0xff]  ;;  %v2548_v0 = vld [vmem:[%s3563_s9 + $0xd] ss:$0 sm:$0xff] }
0x1852   :  { %2453 = dma.vmem_to_hbm [thread:$0]  %s2448_s15, 1024, %s3565_s11, [#allocation5], %s3034_s24, %s3034_s24, %s3035_s25  }
0x1853   :  { %s3036_s11 = smov [#allocation2]  }
0x1854   :  { %s2435_s26 = sshll.u32 %s3036_s11, 4  ;;  %s2436_s26 = int_to_ptr.vmem [resolvable:$true] %s2435_s26 }
0x1855   :  { %s2997_s28 = scalar_lea.vmem %s2436_s26, 256  ;;  %p3002_p9 = scmp.lt.s32.totalorder %s2436_s26, %s2436_s26 }
0x1856   :  { %p2998_p8 = scmp.ne.s32.totalorder %s2436_s26, %s2997_s28  ;;  %p3003_p10 = scmp.lt.s32.totalorder %s2997_s28, %s2997_s28 }
0x1858   :  { %p3004_p11 = por %p3003_p10, %p3002_p9 }
0x185a   :  { %p3005_p12 = pnand %p3004_p11, %p2998_p8 }
0x18d5   :  { %v2407_v36 = vpop.xlane.xlu1 %2406 }
0x18d6   :  { %v2409_v56 = vmul.f32 0.03125, %v2407_v36  ;;  %v2404_v58 = vpop.xlane.xlu0 %2403 }
0x18d7   :  { %v2408_v57 = vmul.f32 0.03125, %v2404_v58 }
0x18d8   :  { %v2411_v60 = vadd.f32 1e-06, %v2409_v56 }
0x18d9   :  { %v2410_v61 = vadd.f32 1e-06, %v2408_v57 }
0x18da   :  { %2971 = vrsqrt.f32 %v2411_v60 }
0x18db   :  { %2973 = vrsqrt.f32 %v2410_v61 }
0x18e4   :  { %v2972_v41 = vpop.eup %2971 }
0x18e5   :  { %v2974_v63 = vpop.eup %2973  ;;  %v2415_v59 = vmul.f32 %v2972_v41, %v2399_v51 }
0x18e6   :  { %v2414_v1 = vmul.f32 %v2974_v63, %v2398_v52 }
0x18e7   :  { %v2421_v2 = vmul.f32 %v2547_v62, %v2415_v59 }
0x18e8   :  { %v2420_v3 = vmul.f32 %v2547_v62, %v2414_v1 }
0x18e9   :  { %v2427_v6 = vadd.f32 %v2548_v0, %v2421_v2 }
0x18ea   :  { %v2426_v7 = vadd.f32 %v2548_v0, %v2420_v3 }
0x18eb   :  { %2429 = vst.msk [vmem:[#allocation2 + $0x8] sm:$0xff] %vm43_vm0, %v2427_v6 }
0x18ec   :  { %2428 = vst.msk [vmem:[#allocation2] sm:$0xff] %vm43_vm0, %v2426_v7 }
0x18ed   :  { %3008 = shalt.err (!%p3005_p12)
}
0x18ee   :  { %s3009_s29 = scalar_lea.hbm %s3564_s10, 256 }
0x18ef   :  { %p3010_p13 = scmp.ne.s32.totalorder %s3564_s10, %s3009_s29  ;;  %p3013_p0 = scmp.lt.u32.totalorder %s3009_s29, %s3564_s10 }
0x18f1   :  { %p3015_p1 = pnand %p3013_p0, %p3010_p13 }
0x18f3   :  { %3018 = shalt.err (!%p3015_p1)
}
0x18f4   :  { %2441 = dma.vmem_to_hbm [thread:$0]  %s2436_s26, 256, %s3564_s10, [#allocation3], %s3034_s24, %s3034_s24, %s3035_s25  }
0x18f5   :  { %3019 = dma.done.wait [#allocation3], 256  }
0x18f6   :  { %3020 = vsyncadd [#allocation3], 4294967040 }
0x18f7   :  { %3021 = dma.done.wait [#allocation5], 1024  }
0x18f8   :  { %3022 = vsyncadd [#allocation5], 4294966272 }
0x18f9   :  { %2460 = vsyncpa [#allocation3], 1 }
0x18fa   :  { %2461 = vsyncpa [#allocation5], 1 }

</bundles_post_ra>
